<compile_context>
chip_gen: v7x
topology: tpu7x:2x2x1
jax: 0.10.0
libtpu: 0.0.40
codegen_flags: <defaults>
</compile_context>

<pallas_src>
import jax
import jax.numpy as jnp
from jax.experimental import pallas as pl
from jax.experimental.pallas import tpu as pltpu

NEG_SLOPE = 0.01     # torch.nn.LeakyReLU default
BN_EPS = 1e-5        # torch.nn.BatchNorm1d default
LANE = 128
NEG_INF = -1e30


def _leaky(x):
    return jnp.where(x >= 0, x, NEG_SLOPE * x)


def _round_up(v, m):
    return -(-v // m) * m


# ------------------------------ parameters ---------------------------------

def init_params(key, in_f, hid, out_f, eig_len, heads=4,
                num_layers=2, num_proj_layers=2):
    keys = iter(jax.random.split(key, 128))

    def lin(fan_in, fan_out):
        w = 0.1 * jax.random.normal(next(keys), (fan_in, fan_out), jnp.float32)
        b = jnp.zeros((1, fan_out), jnp.float32)
        return w, b

    def tconv(in_ch, out_ch, h):
        d = {'heads': h, 'out_ch': out_ch}
        d['wq'], d['bq'] = lin(in_ch, h * out_ch)
        d['wk'], d['bk'] = lin(in_ch, h * out_ch)
        d['wv'], d['bv'] = lin(in_ch, h * out_ch)
        d['ws'], d['bs'] = lin(in_ch, h * out_ch)   # lin_skip (root weight)
        return d

    params = {}
    w1, b1 = lin(in_f, hid)
    w2, b2 = lin(hid, hid)
    params['pre'] = (w1, b1, w2, b2)

    layers = []
    blk = tconv(hid + eig_len, hid, heads)
    blk['wp'], blk['bp'] = lin(heads * hid, hid)
    blk['gamma'] = jnp.ones((1, hid), jnp.float32)
    blk['beta'] = jnp.zeros((1, hid), jnp.float32)
    layers.append(blk)
    prev = hid
    for _ in range(num_layers - 2):
        blk = tconv(hid + prev + eig_len, hid, heads)
        blk['wp'], blk['bp'] = lin(heads * hid, hid)
        blk['gamma'] = jnp.ones((1, hid), jnp.float32)
        blk['beta'] = jnp.zeros((1, hid), jnp.float32)
        layers.append(blk)
        prev = hid
    layers.append(tconv(hid + prev + eig_len, hid, 1))   # final plain TransformerConv
    params['layers'] = layers

    head = []
    for _ in range(num_proj_layers - 1):
        head.extend(lin(hid, hid))
    head.extend(lin(hid, out_f))
    params['head'] = tuple(head)

    params['eigenvecs'] = jax.random.normal(next(keys), (eig_len, eig_len), jnp.float32)
    return params


# ------------------------------ parameter packing ---------------------------

class _WPack:
    """Stack weight blocks (<=128 cols each) into one contiguous (R, 128) buffer."""

    def __init__(self):
        self.blocks, self.row = [], 0

    def add(self, a):
        a = jnp.asarray(a, jnp.float32)
        r = _round_up(a.shape[0], 8)
        self.blocks.append(jnp.pad(a, ((0, r - a.shape[0]), (0, LANE - a.shape[1]))))
        off = self.row
        self.row += r
        return (off, r)          # (row offset, rounded contraction rows)

    def finalize(self):
        return jnp.concatenate(self.blocks, axis=0)


class _VPack:
    """Stack 128-lane row vectors (biases / BN affine) into one (V, 128) buffer."""

    def __init__(self):
        self.rows = []

    def add(self, v, fill=0.0):
        v = jnp.asarray(v, jnp.float32).reshape(1, -1)
        self.rows.append(jnp.pad(v, ((0, 0), (0, LANE - v.shape[1])),
                                 constant_values=fill))
        return len(self.rows) - 1

    def finalize(self):
        n = _round_up(len(self.rows), 8)
        rows = self.rows + [jnp.zeros((1, LANE), jnp.float32)] * (n - len(self.rows))
        return jnp.concatenate(rows, axis=0)


def pack_params(params):
    """Pack torch-style params into (wbuf, vbuf) + a static offset config. Run ONCE."""
    w1, b1, w2, b2 = params['pre']
    in_f, hid = w1.shape
    eig = params['eigenvecs'].shape[1]
    out_f = params['head'][-1].shape[1]
    assert max(in_f, hid, eig, out_f) <= LANE, "feature dims must fit one 128-lane vreg"

    wpk, vpk = _WPack(), _VPack()
    cfg = {'hid': hid, 'in_f': in_f, 'eig': eig, 'out_f': out_f}

    cfg['pre'] = {'w1': wpk.add(w1), 'b1': vpk.add(b1),
                  'w2': wpk.add(w2), 'b2': vpk.add(b2)}

    layer_cfgs = []
    for li, layer in enumerate(params['layers']):
        H, C = layer['heads'], layer['out_ch']
        HC = H * C
        nb = _round_up(HC, LANE) // LANE
        slot = nb * LANE
        if li == 0:                                   # layer input = [x, pos]
            splits = [('x', 0, hid), ('pos', hid, eig)]
        else:                                         # layer input = [x, prev, pos]
            splits = [('x', 0, hid), ('prev', hid, hid), ('pos', 2 * hid, eig)]

        lc = {'heads': H, 'out_ch': C, 'has_tail': 'wp' in layer,
              'nblk': nb, 'slot': slot, 'w': [], 'b': []}
        for wname, bname in (('wq', 'bq'), ('wk', 'bk'), ('wv', 'bv'), ('ws', 'bs')):
            wfull, bfull = layer[wname], layer[bname]
            per_inp = {name: [wpk.add(wfull[r0:r0 + rw, j * LANE:min((j + 1) * LANE, HC)])
                              for j in range(nb)]
                       for name, r0, rw in splits}
            lc['w'].append(per_inp)
            lc['b'].append([vpk.add(bfull[:, j * LANE:min((j + 1) * LANE, HC)])
                            for j in range(nb)])
        if lc['has_tail']:
            wproj = jnp.pad(layer['wp'], ((0, slot - HC), (0, 0)))   # (slot, C)
            lc['wp'] = wpk.add(wproj)
            lc['bp'] = vpk.add(layer['bp'])
            lc['gamma'] = vpk.add(layer['gamma'])
            lc['beta'] = vpk.add(layer['beta'])
        layer_cfgs.append(lc)
    cfg['layers'] = layer_cfgs

    head = params['head']
    n_lin = len(head) // 2
    cfg['head'] = []
    for i in range(n_lin):
        is_last = i == n_lin - 1
        # final bias padded with -1e30 so padded logit lanes drop out of LogSumExp
        cfg['head'].append((wpk.add(head[2 * i]),
                            vpk.add(head[2 * i + 1],
                                    fill=(NEG_INF if is_last else 0.0)),
                            is_last))

    return wpk.finalize(), vpk.finalize(), cfg


# ------------------------------ fused kernel --------------------------------

def make_fused_kernel(cfg, n):
    f32 = jnp.float32

    def kernel(agent_ref, x0_ref, mask_ref, pos_ref, w_ref, v_ref, o_ref, xs_ref):
        def vrow(idx):                                  # (1, 128) packed row-vector
            return v_ref[idx:idx + 1, :]

        def mm(val, spec):                              # val[:, :rows] @ packed block
            off, rows = spec
            return jnp.dot(val[:, :rows], w_ref[off:off + rows, :],
                           preferred_element_type=f32)

        mask = mask_ref[...]                            # (N, N), mask[i, j] = edge j -> i
        addmask = jnp.where(mask > 0, 0.0, NEG_INF)     # hoisted: computed once per kernel
        pos = pos_ref[...]                              # (N, 128)

        # --- preprocess: Linear -> LeakyReLU -> Linear (all activations 128-lane padded)
        pre = cfg['pre']
        h = _leaky(mm(x0_ref[...], pre['w1']) + vrow(pre['b1']))
        x = mm(h, pre['w2']) + vrow(pre['b2'])

        # --- TransformerConv layers (dense masked attention)
        prev = None
        for lc in cfg['layers']:
            H, C, slot, nb = lc['heads'], lc['out_ch'], lc['slot'], lc['nblk']
            HC = H * C
            scale = 1.0 / float(C) ** 0.5

            inputs = [('x', x)]
            if prev is not None:
                inputs.append(('prev', prev))
            inputs.append(('pos', pos))

            # q/k/v/skip: each lives in its own 128-lane-aligned slot; split-K over
            # [x, prev, pos] with bias folded in (no feature concat is materialized).
            comps = []
            for ci in range(4):
                blocks = []
                for j in range(nb):
                    acc = vrow(lc['b'][ci][j])
                    for name, val in inputs:
                        acc = acc + mm(val, lc['w'][ci][name][j])
                    blocks.append(acc)
                comps.append(blocks[0] if nb == 1 else jnp.concatenate(blocks, axis=1))
            q, k, v, skip = comps                       # each (N, slot)

            def attn(lo, width):
                qh = q[:, lo:lo + width]
                kh = k[:, lo:lo + width]
                vh = v[:, lo:lo + width]
                s = jax.lax.dot_general(qh, kh, (((1,), (1,)), ((), ())),
                                        preferred_element_type=f32) * scale + addmask
                m = jnp.max(s, axis=1, keepdims=True)
                p = jnp.exp(s - m) * mask               # exact softmax over existing edges
                den = jnp.sum(p, axis=1, keepdims=True)
                alpha = p / jnp.where(den > 0, den, 1.0)   # rows without in-edges -> 0
                return jnp.dot(alpha, vh, preferred_element_type=f32)

            if lc['has_tail']:
                # TransformerBlock: proj(concat(att_heads) + skip) -> BN (batch stats)
                # -> LeakyReLU.  One contraction-`slot` matmul instead of H small ones.
                att = jnp.concatenate([attn(hh * C, C) for hh in range(H)], axis=1)
                if HC < slot:
                    att = jnp.concatenate([att, jnp.zeros((n, slot - HC), f32)], axis=1)
                t = att + skip                                      # (N, slot)
                y = mm(t, lc['wp']) + vrow(lc['bp'])
                mean = jnp.mean(y, axis=0, keepdims=True)
                var = jnp.mean((y - mean) ** 2, axis=0, keepdims=True)
                yn = (y - mean) * jax.lax.rsqrt(var + BN_EPS)
                new_x = _leaky(yn * vrow(lc['gamma']) + vrow(lc['beta']))
            else:
                # final plain TransformerConv (heads == 1 in this architecture): the
                # single head uses the full zero-padded slot -> no sub-vreg slices.
                if H == 1:
                    new_x = attn(0, slot) + skip
                else:
                    att = jnp.concatenate([attn(hh * C, C) for hh in range(H)], axis=1)
                    if HC < slot:
                        att = jnp.concatenate([att, jnp.zeros((n, slot - HC), f32)],
                                              axis=1)
                    new_x = att + skip

            prev, x = x, new_x

        # --- agent-row gather: dynamic sublane read from VMEM scratch (SMEM scalar)
        xs_ref[...] = x[:, :LANE]
        agent = agent_ref[0]
        hrow = xs_ref[pl.ds(agent, 1), :]               # (1, 128)

        # --- proj_head (Linear / LeakyReLU ... Linear) + LogSoftmax(dim=1)
        for wspec, brow, is_last in cfg['head']:
            hrow = mm(hrow, wspec) + vrow(brow)
            if not is_last:
                hrow = _leaky(hrow)
        m = jnp.max(hrow, axis=1, keepdims=True)
        lse = jnp.log(jnp.sum(jnp.exp(hrow - m), axis=1, keepdims=True)) + m
        o_ref[...] = jnp.broadcast_to(hrow - lse, (8, LANE))   # lane/sublane-dense store

    return kernel


# ------------------------------ forward pass --------------------------------

def make_policy_forward(cfg):
    out_f = cfg['out_f']

    @jax.jit
    def forward(wbuf, vbuf, eigenvecs, node_features, edge_index,
                agent_index, subgraph_indices):
        n, in_f = node_features.shape
        # XLA glue (inside the jit): lane-pad features/pos, dense adjacency mask, scalar.
        x0 = jnp.pad(node_features.astype(jnp.float32), ((0, 0), (0, LANE - in_f)))
        pos = jnp.take(eigenvecs.astype(jnp.float32), subgraph_indices, axis=0)
        if pos.shape[0] != n:
            pos = jnp.pad(pos, ((0, n - pos.shape[0]), (0, 0)))
        pos = jnp.pad(pos, ((0, 0), (0, LANE - pos.shape[1])))
        mask = jnp.zeros((n, n), jnp.float32).at[edge_index[1], edge_index[0]].set(1.0)
        agent = jnp.asarray(agent_index, jnp.int32).reshape((1,))

        kernel = make_fused_kernel(cfg, n)
        vmem = pl.BlockSpec(memory_space=pltpu.MemorySpace.VMEM)
        smem = pl.BlockSpec(memory_space=pltpu.MemorySpace.SMEM)
        out = pl.pallas_call(
            kernel,
            out_shape=jax.ShapeDtypeStruct((8, LANE), jnp.float32),
            in_specs=[smem, vmem, vmem, vmem, vmem, vmem],
            out_specs=vmem,
            scratch_shapes=[pltpu.VMEM((n, LANE), jnp.float32)],
        )(agent, x0, mask, pos, wbuf, vbuf)
        return out[0:1, 0:out_f]

    return forward


# --------------------------------- main --------------------------------------

if __name__ == "__main__":
    N, IN_F, HID, OUT_F, EIG = 16, 8, 32, 4, 16

    root = jax.random.PRNGKey(0)
    k_params, k_feat = jax.random.split(root)

    params = init_params(k_params, IN_F, HID, OUT_F, EIG, heads=4,
                         num_layers=2, num_proj_layers=2)

    # pre-pack ONCE (host side); the packed buffers are reused on every call
    wbuf, vbuf, cfg = pack_params(params)
    policy_forward = make_policy_forward(cfg)

    node_features = jax.random.normal(k_feat, (N, IN_F), jnp.float32)

    # deterministic bidirectional ring graph (every node has in/out edges)
    src = jnp.arange(N, dtype=jnp.int32)
    dst = (src + 1) % N
    edge_index = jnp.stack([jnp.concatenate([src, dst]),
                            jnp.concatenate([dst, src])], axis=0)   # (2, 2N)

    subgraph_indices = jnp.arange(N, dtype=jnp.int32)
    agent_index = 3

    log_probs = policy_forward(wbuf, vbuf, params['eigenvecs'], node_features,
                               edge_index, agent_index, subgraph_indices)
    jax.block_until_ready(log_probs)
    assert log_probs.shape == (1, OUT_F)
    print("KERNEL_OK")
</pallas_src>

<mosaic_0001>
module attributes {stable_mosaic.version = 11 : i64} {
  func.func @kernel(%arg0: memref<1xi32, #tpu.memory_space<smem>>, %arg1: memref<16x128xf32, #tpu.memory_space<vmem>>, %arg2: memref<16x16xf32, #tpu.memory_space<vmem>>, %arg3: memref<16x128xf32, #tpu.memory_space<vmem>>, %arg4: memref<744x128xf32, #tpu.memory_space<vmem>>, %arg5: memref<16x128xf32, #tpu.memory_space<vmem>>, %arg6: memref<8x128xf32, #tpu.memory_space<vmem>>, %arg7: memref<16x128xf32, #tpu.memory_space<vmem>>) attributes {dimension_semantics = [], scalar_prefetch = 0 : i64, scratch_operands = 1 : i64, tpu.core_type = #tpu.core_type<tc>} {
    %c0 = arith.constant 0 : index
    %c0_0 = arith.constant 0 : index
    %0 = vector.load %arg2[%c0, %c0_0] : memref<16x16xf32, #tpu.memory_space<vmem>>, vector<16x16xf32>
    %cst = arith.constant 0.000000e+00 : f32
    %1 = vector.broadcast %cst : f32 to vector<16x16xf32>
    %2 = arith.cmpf ogt, %0, %1 : vector<16x16xf32>
    %cst_1 = arith.constant 0.000000e+00 : f32
    %cst_2 = arith.constant -1.000000e+30 : f32
    %3 = vector.broadcast %cst_1 : f32 to vector<16x16xf32>
    %4 = vector.broadcast %cst_2 : f32 to vector<16x16xf32>
    %5 = arith.select %2, %3, %4 : vector<16x16xi1>, vector<16x16xf32>
    %c0_3 = arith.constant 0 : index
    %c0_4 = arith.constant 0 : index
    %6 = vector.load %arg3[%c0_3, %c0_4] : memref<16x128xf32, #tpu.memory_space<vmem>>, vector<16x128xf32>
    %c0_5 = arith.constant 0 : index
    %c0_6 = arith.constant 0 : index
    %7 = vector.load %arg1[%c0_5, %c0_6] : memref<16x128xf32, #tpu.memory_space<vmem>>, vector<16x128xf32>
    %8 = vector.extract_strided_slice %7 {offsets = [0, 0], sizes = [16, 8], strides = [1, 1]} : vector<16x128xf32> to vector<16x8xf32>
    %c0_7 = arith.constant 0 : index
    %c0_8 = arith.constant 0 : index
    %9 = vector.load %arg4[%c0_7, %c0_8] : memref<744x128xf32, #tpu.memory_space<vmem>>, vector<8x128xf32>
    %cst_9 = arith.constant dense<0.000000e+00> : vector<16x128xf32>
    %10 = tpu.matmul %8, %9, %cst_9 {dimension_numbers = #tpu.dot_dimension_numbers<[1], [0], [0], [1], [0, 0, 1, 1], [], []>} : vector<16x8xf32>, vector<8x128xf32>, vector<16x128xf32> -> vector<16x128xf32>
    %c0_10 = arith.constant 0 : index
    %c0_11 = arith.constant 0 : index
    %11 = vector.load %arg5[%c0_10, %c0_11] : memref<16x128xf32, #tpu.memory_space<vmem>>, vector<1x128xf32>
    %12 = vector.broadcast %11 : vector<1x128xf32> to vector<16x128xf32>
    %13 = arith.addf %10, %12 : vector<16x128xf32>
    %cst_12 = arith.constant 0.000000e+00 : f32
    %14 = vector.broadcast %cst_12 : f32 to vector<16x128xf32>
    %15 = arith.cmpf oge, %13, %14 : vector<16x128xf32>
    %cst_13 = arith.constant 0.00999999977 : f32
    %16 = vector.broadcast %cst_13 : f32 to vector<16x128xf32>
    %17 = arith.mulf %16, %13 : vector<16x128xf32>
    %18 = arith.select %15, %13, %17 : vector<16x128xi1>, vector<16x128xf32>
    %19 = vector.extract_strided_slice %18 {offsets = [0, 0], sizes = [16, 32], strides = [1, 1]} : vector<16x128xf32> to vector<16x32xf32>
    %c8 = arith.constant 8 : index
    %c0_14 = arith.constant 0 : index
    %20 = vector.load %arg4[%c8, %c0_14] : memref<744x128xf32, #tpu.memory_space<vmem>>, vector<32x128xf32>
    %cst_15 = arith.constant dense<0.000000e+00> : vector<16x128xf32>
    %21 = tpu.matmul %19, %20, %cst_15 {dimension_numbers = #tpu.dot_dimension_numbers<[1], [0], [0], [1], [0, 0, 1, 1], [], []>} : vector<16x32xf32>, vector<32x128xf32>, vector<16x128xf32> -> vector<16x128xf32>
    %c1 = arith.constant 1 : index
    %c0_16 = arith.constant 0 : index
    %22 = vector.load %arg5[%c1, %c0_16] : memref<16x128xf32, #tpu.memory_space<vmem>>, vector<1x128xf32>
    %23 = vector.broadcast %22 : vector<1x128xf32> to vector<16x128xf32>
    %24 = arith.addf %21, %23 : vector<16x128xf32>
    %c2 = arith.constant 2 : index
    %c0_17 = arith.constant 0 : index
    %25 = vector.load %arg5[%c2, %c0_17] : memref<16x128xf32, #tpu.memory_space<vmem>>, vector<1x128xf32>
    %26 = vector.extract_strided_slice %24 {offsets = [0, 0], sizes = [16, 32], strides = [1, 1]} : vector<16x128xf32> to vector<16x32xf32>
    %c40 = arith.constant 40 : index
    %c0_18 = arith.constant 0 : index
    %27 = vector.load %arg4[%c40, %c0_18] : memref<744x128xf32, #tpu.memory_space<vmem>>, vector<32x128xf32>
    %cst_19 = arith.constant dense<0.000000e+00> : vector<16x128xf32>
    %28 = tpu.matmul %26, %27, %cst_19 {dimension_numbers = #tpu.dot_dimension_numbers<[1], [0], [0], [1], [0, 0, 1, 1], [], []>} : vector<16x32xf32>, vector<32x128xf32>, vector<16x128xf32> -> vector<16x128xf32>
    %29 = vector.broadcast %25 : vector<1x128xf32> to vector<16x128xf32>
    %30 = arith.addf %29, %28 : vector<16x128xf32>
    %31 = vector.extract_strided_slice %6 {offsets = [0, 0], sizes = [16, 16], strides = [1, 1]} : vector<16x128xf32> to vector<16x16xf32>
    %c72 = arith.constant 72 : index
    %c0_20 = arith.constant 0 : index
    %32 = vector.load %arg4[%c72, %c0_20] : memref<744x128xf32, #tpu.memory_space<vmem>>, vector<16x128xf32>
    %cst_21 = arith.constant dense<0.000000e+00> : vector<16x128xf32>
    %33 = tpu.matmul %31, %32, %cst_21 {dimension_numbers = #tpu.dot_dimension_numbers<[1], [0], [0], [1], [0, 0, 1, 1], [], []>} : vector<16x16xf32>, vector<16x128xf32>, vector<16x128xf32> -> vector<16x128xf32>
    %34 = arith.addf %30, %33 : vector<16x128xf32>
    %c3 = arith.constant 3 : index
    %c0_22 = arith.constant 0 : index
    %35 = vector.load %arg5[%c3, %c0_22] : memref<16x128xf32, #tpu.memory_space<vmem>>, vector<1x128xf32>
    %36 = vector.extract_strided_slice %24 {offsets = [0, 0], sizes = [16, 32], strides = [1, 1]} : vector<16x128xf32> to vector<16x32xf32>
    %c88 = arith.constant 88 : index
    %c0_23 = arith.constant 0 : index
    %37 = vector.load %arg4[%c88, %c0_23] : memref<744x128xf32, #tpu.memory_space<vmem>>, vector<32x128xf32>
    %cst_24 = arith.constant dense<0.000000e+00> : vector<16x128xf32>
    %38 = tpu.matmul %36, %37, %cst_24 {dimension_numbers = #tpu.dot_dimension_numbers<[1], [0], [0], [1], [0, 0, 1, 1], [], []>} : vector<16x32xf32>, vector<32x128xf32>, vector<16x128xf32> -> vector<16x128xf32>
    %39 = vector.broadcast %35 : vector<1x128xf32> to vector<16x128xf32>
    %40 = arith.addf %39, %38 : vector<16x128xf32>
    %41 = vector.extract_strided_slice %6 {offsets = [0, 0], sizes = [16, 16], strides = [1, 1]} : vector<16x128xf32> to vector<16x16xf32>
    %c120 = arith.constant 120 : index
    %c0_25 = arith.constant 0 : index
    %42 = vector.load %arg4[%c120, %c0_25] : memref<744x128xf32, #tpu.memory_space<vmem>>, vector<16x128xf32>
    %cst_26 = arith.constant dense<0.000000e+00> : vector<16x128xf32>
    %43 = tpu.matmul %41, %42, %cst_26 {dimension_numbers = #tpu.dot_dimension_numbers<[1], [0], [0], [1], [0, 0, 1, 1], [], []>} : vector<16x16xf32>, vector<16x128xf32>, vector<16x128xf32> -> vector<16x128xf32>
    %44 = arith.addf %40, %43 : vector<16x128xf32>
    %c4 = arith.constant 4 : index
    %c0_27 = arith.constant 0 : index
    %45 = vector.load %arg5[%c4, %c0_27] : memref<16x128xf32, #tpu.memory_space<vmem>>, vector<1x128xf32>
    %46 = vector.extract_strided_slice %24 {offsets = [0, 0], sizes = [16, 32], strides = [1, 1]} : vector<16x128xf32> to vector<16x32xf32>
    %c136 = arith.constant 136 : index
    %c0_28 = arith.constant 0 : index
    %47 = vector.load %arg4[%c136, %c0_28] : memref<744x128xf32, #tpu.memory_space<vmem>>, vector<32x128xf32>
    %cst_29 = arith.constant dense<0.000000e+00> : vector<16x128xf32>
    %48 = tpu.matmul %46, %47, %cst_29 {dimension_numbers = #tpu.dot_dimension_numbers<[1], [0], [0], [1], [0, 0, 1, 1], [], []>} : vector<16x32xf32>, vector<32x128xf32>, vector<16x128xf32> -> vector<16x128xf32>
    %49 = vector.broadcast %45 : vector<1x128xf32> to vector<16x128xf32>
    %50 = arith.addf %49, %48 : vector<16x128xf32>
    %51 = vector.extract_strided_slice %6 {offsets = [0, 0], sizes = [16, 16], strides = [1, 1]} : vector<16x128xf32> to vector<16x16xf32>
    %c168 = arith.constant 168 : index
    %c0_30 = arith.constant 0 : index
    %52 = vector.load %arg4[%c168, %c0_30] : memref<744x128xf32, #tpu.memory_space<vmem>>, vector<16x128xf32>
    %cst_31 = arith.constant dense<0.000000e+00> : vector<16x128xf32>
    %53 = tpu.matmul %51, %52, %cst_31 {dimension_numbers = #tpu.dot_dimension_numbers<[1], [0], [0], [1], [0, 0, 1, 1], [], []>} : vector<16x16xf32>, vector<16x128xf32>, vector<16x128xf32> -> vector<16x128xf32>
    %54 = arith.addf %50, %53 : vector<16x128xf32>
    %c5 = arith.constant 5 : index
    %c0_32 = arith.constant 0 : index
    %55 = vector.load %arg5[%c5, %c0_32] : memref<16x128xf32, #tpu.memory_space<vmem>>, vector<1x128xf32>
    %56 = vector.extract_strided_slice %24 {offsets = [0, 0], sizes = [16, 32], strides = [1, 1]} : vector<16x128xf32> to vector<16x32xf32>
    %c184 = arith.constant 184 : index
    %c0_33 = arith.constant 0 : index
    %57 = vector.load %arg4[%c184, %c0_33] : memref<744x128xf32, #tpu.memory_space<vmem>>, vector<32x128xf32>
    %cst_34 = arith.constant dense<0.000000e+00> : vector<16x128xf32>
    %58 = tpu.matmul %56, %57, %cst_34 {dimension_numbers = #tpu.dot_dimension_numbers<[1], [0], [0], [1], [0, 0, 1, 1], [], []>} : vector<16x32xf32>, vector<32x128xf32>, vector<16x128xf32> -> vector<16x128xf32>
    %59 = vector.broadcast %55 : vector<1x128xf32> to vector<16x128xf32>
    %60 = arith.addf %59, %58 : vector<16x128xf32>
    %61 = vector.extract_strided_slice %6 {offsets = [0, 0], sizes = [16, 16], strides = [1, 1]} : vector<16x128xf32> to vector<16x16xf32>
    %c216 = arith.constant 216 : index
    %c0_35 = arith.constant 0 : index
    %62 = vector.load %arg4[%c216, %c0_35] : memref<744x128xf32, #tpu.memory_space<vmem>>, vector<16x128xf32>
    %cst_36 = arith.constant dense<0.000000e+00> : vector<16x128xf32>
    %63 = tpu.matmul %61, %62, %cst_36 {dimension_numbers = #tpu.dot_dimension_numbers<[1], [0], [0], [1], [0, 0, 1, 1], [], []>} : vector<16x16xf32>, vector<16x128xf32>, vector<16x128xf32> -> vector<16x128xf32>
    %64 = arith.addf %60, %63 : vector<16x128xf32>
    %65 = vector.extract_strided_slice %34 {offsets = [0, 0], sizes = [16, 32], strides = [1, 1]} : vector<16x128xf32> to vector<16x32xf32>
    %66 = vector.extract_strided_slice %44 {offsets = [0, 0], sizes = [16, 32], strides = [1, 1]} : vector<16x128xf32> to vector<16x32xf32>
    %67 = vector.extract_strided_slice %54 {offsets = [0, 0], sizes = [16, 32], strides = [1, 1]} : vector<16x128xf32> to vector<16x32xf32>
    %cst_37 = arith.constant dense<0.000000e+00> : vector<16x16xf32>
    %68 = tpu.matmul %65, %66, %cst_37 {dimension_numbers = #tpu.dot_dimension_numbers<[1], [1], [0], [0], [0, 0, 1, 0], [], []>} : vector<16x32xf32>, vector<16x32xf32>, vector<16x16xf32> -> vector<16x16xf32>
    %cst_38 = arith.constant 0.176776692 : f32
    %69 = vector.broadcast %cst_38 : f32 to vector<16x16xf32>
    %70 = arith.mulf %68, %69 : vector<16x16xf32>
    %71 = arith.addf %70, %5 : vector<16x16xf32>
    %cst_39 = arith.constant dense<0xFF800000> : vector<16xf32>
    %72 = vector.multi_reduction <maximumf>, %71, %cst_39 [1] : vector<16x16xf32> to vector<16xf32>
    %73 = vector.shape_cast %72 : vector<16xf32> to vector<16x1xf32>
    %74 = vector.broadcast %73 : vector<16x1xf32> to vector<16x16xf32>
    %75 = arith.subf %71, %74 : vector<16x16xf32>
    %76 = math.exp %75 : vector<16x16xf32>
    %77 = arith.mulf %76, %0 : vector<16x16xf32>
    %cst_40 = arith.constant dense<0.000000e+00> : vector<16xf32>
    %78 = vector.multi_reduction <add>, %77, %cst_40 [1] : vector<16x16xf32> to vector<16xf32>
    %79 = vector.shape_cast %78 : vector<16xf32> to vector<16x1xf32>
    %cst_41 = arith.constant 0.000000e+00 : f32
    %80 = vector.broadcast %cst_41 : f32 to vector<16x1xf32>
    %81 = arith.cmpf ogt, %79, %80 : vector<16x1xf32>
    %cst_42 = arith.constant 1.000000e+00 : f32
    %82 = vector.broadcast %cst_42 : f32 to vector<16x1xf32>
    %83 = arith.select %81, %79, %82 : vector<16x1xi1>, vector<16x1xf32>
    %84 = vector.broadcast %83 : vector<16x1xf32> to vector<16x16xf32>
    %85 = arith.divf %77, %84 : vector<16x16xf32>
    %cst_43 = arith.constant dense<0.000000e+00> : vector<16x32xf32>
    %86 = tpu.matmul %85, %67, %cst_43 {dimension_numbers = #tpu.dot_dimension_numbers<[1], [0], [0], [1], [0, 0, 1, 1], [], []>} : vector<16x16xf32>, vector<16x32xf32>, vector<16x32xf32> -> vector<16x32xf32>
    %87 = vector.extract_strided_slice %34 {offsets = [0, 32], sizes = [16, 32], strides = [1, 1]} : vector<16x128xf32> to vector<16x32xf32>
    %88 = vector.extract_strided_slice %44 {offsets = [0, 32], sizes = [16, 32], strides = [1, 1]} : vector<16x128xf32> to vector<16x32xf32>
    %89 = vector.extract_strided_slice %54 {offsets = [0, 32], sizes = [16, 32], strides = [1, 1]} : vector<16x128xf32> to vector<16x32xf32>
    %cst_44 = arith.constant dense<0.000000e+00> : vector<16x16xf32>
    %90 = tpu.matmul %87, %88, %cst_44 {dimension_numbers = #tpu.dot_dimension_numbers<[1], [1], [0], [0], [0, 0, 1, 0], [], []>} : vector<16x32xf32>, vector<16x32xf32>, vector<16x16xf32> -> vector<16x16xf32>
    %cst_45 = arith.constant 0.176776692 : f32
    %91 = vector.broadcast %cst_45 : f32 to vector<16x16xf32>
    %92 = arith.mulf %90, %91 : vector<16x16xf32>
    %93 = arith.addf %92, %5 : vector<16x16xf32>
    %cst_46 = arith.constant dense<0xFF800000> : vector<16xf32>
    %94 = vector.multi_reduction <maximumf>, %93, %cst_46 [1] : vector<16x16xf32> to vector<16xf32>
    %95 = vector.shape_cast %94 : vector<16xf32> to vector<16x1xf32>
    %96 = vector.broadcast %95 : vector<16x1xf32> to vector<16x16xf32>
    %97 = arith.subf %93, %96 : vector<16x16xf32>
    %98 = math.exp %97 : vector<16x16xf32>
    %99 = arith.mulf %98, %0 : vector<16x16xf32>
    %cst_47 = arith.constant dense<0.000000e+00> : vector<16xf32>
    %100 = vector.multi_reduction <add>, %99, %cst_47 [1] : vector<16x16xf32> to vector<16xf32>
    %101 = vector.shape_cast %100 : vector<16xf32> to vector<16x1xf32>
    %cst_48 = arith.constant 0.000000e+00 : f32
    %102 = vector.broadcast %cst_48 : f32 to vector<16x1xf32>
    %103 = arith.cmpf ogt, %101, %102 : vector<16x1xf32>
    %cst_49 = arith.constant 1.000000e+00 : f32
    %104 = vector.broadcast %cst_49 : f32 to vector<16x1xf32>
    %105 = arith.select %103, %101, %104 : vector<16x1xi1>, vector<16x1xf32>
    %106 = vector.broadcast %105 : vector<16x1xf32> to vector<16x16xf32>
    %107 = arith.divf %99, %106 : vector<16x16xf32>
    %cst_50 = arith.constant dense<0.000000e+00> : vector<16x32xf32>
    %108 = tpu.matmul %107, %89, %cst_50 {dimension_numbers = #tpu.dot_dimension_numbers<[1], [0], [0], [1], [0, 0, 1, 1], [], []>} : vector<16x16xf32>, vector<16x32xf32>, vector<16x32xf32> -> vector<16x32xf32>
    %109 = vector.extract_strided_slice %34 {offsets = [0, 64], sizes = [16, 32], strides = [1, 1]} : vector<16x128xf32> to vector<16x32xf32>
    %110 = vector.extract_strided_slice %44 {offsets = [0, 64], sizes = [16, 32], strides = [1, 1]} : vector<16x128xf32> to vector<16x32xf32>
    %111 = vector.extract_strided_slice %54 {offsets = [0, 64], sizes = [16, 32], strides = [1, 1]} : vector<16x128xf32> to vector<16x32xf32>
    %cst_51 = arith.constant dense<0.000000e+00> : vector<16x16xf32>
    %112 = tpu.matmul %109, %110, %cst_51 {dimension_numbers = #tpu.dot_dimension_numbers<[1], [1], [0], [0], [0, 0, 1, 0], [], []>} : vector<16x32xf32>, vector<16x32xf32>, vector<16x16xf32> -> vector<16x16xf32>
    %cst_52 = arith.constant 0.176776692 : f32
    %113 = vector.broadcast %cst_52 : f32 to vector<16x16xf32>
    %114 = arith.mulf %112, %113 : vector<16x16xf32>
    %115 = arith.addf %114, %5 : vector<16x16xf32>
    %cst_53 = arith.constant dense<0xFF800000> : vector<16xf32>
    %116 = vector.multi_reduction <maximumf>, %115, %cst_53 [1] : vector<16x16xf32> to vector<16xf32>
    %117 = vector.shape_cast %116 : vector<16xf32> to vector<16x1xf32>
    %118 = vector.broadcast %117 : vector<16x1xf32> to vector<16x16xf32>
    %119 = arith.subf %115, %118 : vector<16x16xf32>
    %120 = math.exp %119 : vector<16x16xf32>
    %121 = arith.mulf %120, %0 : vector<16x16xf32>
    %cst_54 = arith.constant dense<0.000000e+00> : vector<16xf32>
    %122 = vector.multi_reduction <add>, %121, %cst_54 [1] : vector<16x16xf32> to vector<16xf32>
    %123 = vector.shape_cast %122 : vector<16xf32> to vector<16x1xf32>
    %cst_55 = arith.constant 0.000000e+00 : f32
    %124 = vector.broadcast %cst_55 : f32 to vector<16x1xf32>
    %125 = arith.cmpf ogt, %123, %124 : vector<16x1xf32>
    %cst_56 = arith.constant 1.000000e+00 : f32
    %126 = vector.broadcast %cst_56 : f32 to vector<16x1xf32>
    %127 = arith.select %125, %123, %126 : vector<16x1xi1>, vector<16x1xf32>
    %128 = vector.broadcast %127 : vector<16x1xf32> to vector<16x16xf32>
    %129 = arith.divf %121, %128 : vector<16x16xf32>
    %cst_57 = arith.constant dense<0.000000e+00> : vector<16x32xf32>
    %130 = tpu.matmul %129, %111, %cst_57 {dimension_numbers = #tpu.dot_dimension_numbers<[1], [0], [0], [1], [0, 0, 1, 1], [], []>} : vector<16x16xf32>, vector<16x32xf32>, vector<16x32xf32> -> vector<16x32xf32>
    %131 = vector.extract_strided_slice %34 {offsets = [0, 96], sizes = [16, 32], strides = [1, 1]} : vector<16x128xf32> to vector<16x32xf32>
    %132 = vector.extract_strided_slice %44 {offsets = [0, 96], sizes = [16, 32], strides = [1, 1]} : vector<16x128xf32> to vector<16x32xf32>
    %133 = vector.extract_strided_slice %54 {offsets = [0, 96], sizes = [16, 32], strides = [1, 1]} : vector<16x128xf32> to vector<16x32xf32>
    %cst_58 = arith.constant dense<0.000000e+00> : vector<16x16xf32>
    %134 = tpu.matmul %131, %132, %cst_58 {dimension_numbers = #tpu.dot_dimension_numbers<[1], [1], [0], [0], [0, 0, 1, 0], [], []>} : vector<16x32xf32>, vector<16x32xf32>, vector<16x16xf32> -> vector<16x16xf32>
    %cst_59 = arith.constant 0.176776692 : f32
    %135 = vector.broadcast %cst_59 : f32 to vector<16x16xf32>
    %136 = arith.mulf %134, %135 : vector<16x16xf32>
    %137 = arith.addf %136, %5 : vector<16x16xf32>
    %cst_60 = arith.constant dense<0xFF800000> : vector<16xf32>
    %138 = vector.multi_reduction <maximumf>, %137, %cst_60 [1] : vector<16x16xf32> to vector<16xf32>
    %139 = vector.shape_cast %138 : vector<16xf32> to vector<16x1xf32>
    %140 = vector.broadcast %139 : vector<16x1xf32> to vector<16x16xf32>
    %141 = arith.subf %137, %140 : vector<16x16xf32>
    %142 = math.exp %141 : vector<16x16xf32>
    %143 = arith.mulf %142, %0 : vector<16x16xf32>
    %cst_61 = arith.constant dense<0.000000e+00> : vector<16xf32>
    %144 = vector.multi_reduction <add>, %143, %cst_61 [1] : vector<16x16xf32> to vector<16xf32>
    %145 = vector.shape_cast %144 : vector<16xf32> to vector<16x1xf32>
    %cst_62 = arith.constant 0.000000e+00 : f32
    %146 = vector.broadcast %cst_62 : f32 to vector<16x1xf32>
    %147 = arith.cmpf ogt, %145, %146 : vector<16x1xf32>
    %cst_63 = arith.constant 1.000000e+00 : f32
    %148 = vector.broadcast %cst_63 : f32 to vector<16x1xf32>
    %149 = arith.select %147, %145, %148 : vector<16x1xi1>, vector<16x1xf32>
    %150 = vector.broadcast %149 : vector<16x1xf32> to vector<16x16xf32>
    %151 = arith.divf %143, %150 : vector<16x16xf32>
    %cst_64 = arith.constant dense<0.000000e+00> : vector<16x32xf32>
    %152 = tpu.matmul %151, %133, %cst_64 {dimension_numbers = #tpu.dot_dimension_numbers<[1], [0], [0], [1], [0, 0, 1, 1], [], []>} : vector<16x16xf32>, vector<16x32xf32>, vector<16x32xf32> -> vector<16x32xf32>
    %153 = tpu.concatenate %86, %108, %130, %152 in 1 : vector<16x32xf32>, vector<16x32xf32>, vector<16x32xf32>, vector<16x32xf32> -> vector<16x128xf32>
    %154 = arith.addf %153, %64 : vector<16x128xf32>
    %c232 = arith.constant 232 : index
    %c0_65 = arith.constant 0 : index
    %155 = vector.load %arg4[%c232, %c0_65] : memref<744x128xf32, #tpu.memory_space<vmem>>, vector<128x128xf32>
    %cst_66 = arith.constant dense<0.000000e+00> : vector<16x128xf32>
    %156 = tpu.matmul %154, %155, %cst_66 {dimension_numbers = #tpu.dot_dimension_numbers<[1], [0], [0], [1], [0, 0, 1, 1], [], []>} : vector<16x128xf32>, vector<128x128xf32>, vector<16x128xf32> -> vector<16x128xf32>
    %c6 = arith.constant 6 : index
    %c0_67 = arith.constant 0 : index
    %157 = vector.load %arg5[%c6, %c0_67] : memref<16x128xf32, #tpu.memory_space<vmem>>, vector<1x128xf32>
    %158 = vector.broadcast %157 : vector<1x128xf32> to vector<16x128xf32>
    %159 = arith.addf %156, %158 : vector<16x128xf32>
    %cst_68 = arith.constant dense<0.000000e+00> : vector<128xf32>
    %160 = vector.multi_reduction <add>, %159, %cst_68 [0] : vector<16x128xf32> to vector<128xf32>
    %161 = vector.shape_cast %160 : vector<128xf32> to vector<1x128xf32>
    %cst_69 = arith.constant 1.600000e+01 : f32
    %162 = vector.broadcast %cst_69 : f32 to vector<1x128xf32>
    %163 = arith.divf %161, %162 : vector<1x128xf32>
    %164 = vector.broadcast %163 : vector<1x128xf32> to vector<16x128xf32>
    %165 = arith.subf %159, %164 : vector<16x128xf32>
    %166 = arith.mulf %165, %165 : vector<16x128xf32>
    %cst_70 = arith.constant dense<0.000000e+00> : vector<128xf32>
    %167 = vector.multi_reduction <add>, %166, %cst_70 [0] : vector<16x128xf32> to vector<128xf32>
    %168 = vector.shape_cast %167 : vector<128xf32> to vector<1x128xf32>
    %cst_71 = arith.constant 1.600000e+01 : f32
    %169 = vector.broadcast %cst_71 : f32 to vector<1x128xf32>
    %170 = arith.divf %168, %169 : vector<1x128xf32>
    %171 = vector.broadcast %163 : vector<1x128xf32> to vector<16x128xf32>
    %172 = arith.subf %159, %171 : vector<16x128xf32>
    %cst_72 = arith.constant 9.99999974E-6 : f32
    %173 = vector.broadcast %cst_72 : f32 to vector<1x128xf32>
    %174 = arith.addf %170, %173 : vector<1x128xf32>
    %175 = math.rsqrt %174 : vector<1x128xf32>
    %176 = vector.broadcast %175 : vector<1x128xf32> to vector<16x128xf32>
    %177 = arith.mulf %172, %176 : vector<16x128xf32>
    %c7 = arith.constant 7 : index
    %c0_73 = arith.constant 0 : index
    %178 = vector.load %arg5[%c7, %c0_73] : memref<16x128xf32, #tpu.memory_space<vmem>>, vector<1x128xf32>
    %179 = vector.broadcast %178 : vector<1x128xf32> to vector<16x128xf32>
    %180 = arith.mulf %177, %179 : vector<16x128xf32>
    %c8_74 = arith.constant 8 : index
    %c0_75 = arith.constant 0 : index
    %181 = vector.load %arg5[%c8_74, %c0_75] : memref<16x128xf32, #tpu.memory_space<vmem>>, vector<1x128xf32>
    %182 = vector.broadcast %181 : vector<1x128xf32> to vector<16x128xf32>
    %183 = arith.addf %180, %182 : vector<16x128xf32>
    %cst_76 = arith.constant 0.000000e+00 : f32
    %184 = vector.broadcast %cst_76 : f32 to vector<16x128xf32>
    %185 = arith.cmpf oge, %183, %184 : vector<16x128xf32>
    %cst_77 = arith.constant 0.00999999977 : f32
    %186 = vector.broadcast %cst_77 : f32 to vector<16x128xf32>
    %187 = arith.mulf %186, %183 : vector<16x128xf32>
    %188 = arith.select %185, %183, %187 : vector<16x128xi1>, vector<16x128xf32>
    %c9 = arith.constant 9 : index
    %c0_78 = arith.constant 0 : index
    %189 = vector.load %arg5[%c9, %c0_78] : memref<16x128xf32, #tpu.memory_space<vmem>>, vector<1x128xf32>
    %190 = vector.extract_strided_slice %188 {offsets = [0, 0], sizes = [16, 32], strides = [1, 1]} : vector<16x128xf32> to vector<16x32xf32>
    %c360 = arith.constant 360 : index
    %c0_79 = arith.constant 0 : index
    %191 = vector.load %arg4[%c360, %c0_79] : memref<744x128xf32, #tpu.memory_space<vmem>>, vector<32x128xf32>
    %cst_80 = arith.constant dense<0.000000e+00> : vector<16x128xf32>
    %192 = tpu.matmul %190, %191, %cst_80 {dimension_numbers = #tpu.dot_dimension_numbers<[1], [0], [0], [1], [0, 0, 1, 1], [], []>} : vector<16x32xf32>, vector<32x128xf32>, vector<16x128xf32> -> vector<16x128xf32>
    %193 = vector.broadcast %189 : vector<1x128xf32> to vector<16x128xf32>
    %194 = arith.addf %193, %192 : vector<16x128xf32>
    %195 = vector.extract_strided_slice %24 {offsets = [0, 0], sizes = [16, 32], strides = [1, 1]} : vector<16x128xf32> to vector<16x32xf32>
    %c392 = arith.constant 392 : index
    %c0_81 = arith.constant 0 : index
    %196 = vector.load %arg4[%c392, %c0_81] : memref<744x128xf32, #tpu.memory_space<vmem>>, vector<32x128xf32>
    %cst_82 = arith.constant dense<0.000000e+00> : vector<16x128xf32>
    %197 = tpu.matmul %195, %196, %cst_82 {dimension_numbers = #tpu.dot_dimension_numbers<[1], [0], [0], [1], [0, 0, 1, 1], [], []>} : vector<16x32xf32>, vector<32x128xf32>, vector<16x128xf32> -> vector<16x128xf32>
    %198 = arith.addf %194, %197 : vector<16x128xf32>
    %199 = vector.extract_strided_slice %6 {offsets = [0, 0], sizes = [16, 16], strides = [1, 1]} : vector<16x128xf32> to vector<16x16xf32>
    %c424 = arith.constant 424 : index
    %c0_83 = arith.constant 0 : index
    %200 = vector.load %arg4[%c424, %c0_83] : memref<744x128xf32, #tpu.memory_space<vmem>>, vector<16x128xf32>
    %cst_84 = arith.constant dense<0.000000e+00> : vector<16x128xf32>
    %201 = tpu.matmul %199, %200, %cst_84 {dimension_numbers = #tpu.dot_dimension_numbers<[1], [0], [0], [1], [0, 0, 1, 1], [], []>} : vector<16x16xf32>, vector<16x128xf32>, vector<16x128xf32> -> vector<16x128xf32>
    %202 = arith.addf %198, %201 : vector<16x128xf32>
    %c10 = arith.constant 10 : index
    %c0_85 = arith.constant 0 : index
    %203 = vector.load %arg5[%c10, %c0_85] : memref<16x128xf32, #tpu.memory_space<vmem>>, vector<1x128xf32>
    %204 = vector.extract_strided_slice %188 {offsets = [0, 0], sizes = [16, 32], strides = [1, 1]} : vector<16x128xf32> to vector<16x32xf32>
    %c440 = arith.constant 440 : index
    %c0_86 = arith.constant 0 : index
    %205 = vector.load %arg4[%c440, %c0_86] : memref<744x128xf32, #tpu.memory_space<vmem>>, vector<32x128xf32>
    %cst_87 = arith.constant dense<0.000000e+00> : vector<16x128xf32>
    %206 = tpu.matmul %204, %205, %cst_87 {dimension_numbers = #tpu.dot_dimension_numbers<[1], [0], [0], [1], [0, 0, 1, 1], [], []>} : vector<16x32xf32>, vector<32x128xf32>, vector<16x128xf32> -> vector<16x128xf32>
    %207 = vector.broadcast %203 : vector<1x128xf32> to vector<16x128xf32>
    %208 = arith.addf %207, %206 : vector<16x128xf32>
    %209 = vector.extract_strided_slice %24 {offsets = [0, 0], sizes = [16, 32], strides = [1, 1]} : vector<16x128xf32> to vector<16x32xf32>
    %c472 = arith.constant 472 : index
    %c0_88 = arith.constant 0 : index
    %210 = vector.load %arg4[%c472, %c0_88] : memref<744x128xf32, #tpu.memory_space<vmem>>, vector<32x128xf32>
    %cst_89 = arith.constant dense<0.000000e+00> : vector<16x128xf32>
    %211 = tpu.matmul %209, %210, %cst_89 {dimension_numbers = #tpu.dot_dimension_numbers<[1], [0], [0], [1], [0, 0, 1, 1], [], []>} : vector<16x32xf32>, vector<32x128xf32>, vector<16x128xf32> -> vector<16x128xf32>
    %212 = arith.addf %208, %211 : vector<16x128xf32>
    %213 = vector.extract_strided_slice %6 {offsets = [0, 0], sizes = [16, 16], strides = [1, 1]} : vector<16x128xf32> to vector<16x16xf32>
    %c504 = arith.constant 504 : index
    %c0_90 = arith.constant 0 : index
    %214 = vector.load %arg4[%c504, %c0_90] : memref<744x128xf32, #tpu.memory_space<vmem>>, vector<16x128xf32>
    %cst_91 = arith.constant dense<0.000000e+00> : vector<16x128xf32>
    %215 = tpu.matmul %213, %214, %cst_91 {dimension_numbers = #tpu.dot_dimension_numbers<[1], [0], [0], [1], [0, 0, 1, 1], [], []>} : vector<16x16xf32>, vector<16x128xf32>, vector<16x128xf32> -> vector<16x128xf32>
    %216 = arith.addf %212, %215 : vector<16x128xf32>
    %c11 = arith.constant 11 : index
    %c0_92 = arith.constant 0 : index
    %217 = vector.load %arg5[%c11, %c0_92] : memref<16x128xf32, #tpu.memory_space<vmem>>, vector<1x128xf32>
    %218 = vector.extract_strided_slice %188 {offsets = [0, 0], sizes = [16, 32], strides = [1, 1]} : vector<16x128xf32> to vector<16x32xf32>
    %c520 = arith.constant 520 : index
    %c0_93 = arith.constant 0 : index
    %219 = vector.load %arg4[%c520, %c0_93] : memref<744x128xf32, #tpu.memory_space<vmem>>, vector<32x128xf32>
    %cst_94 = arith.constant dense<0.000000e+00> : vector<16x128xf32>
    %220 = tpu.matmul %218, %219, %cst_94 {dimension_numbers = #tpu.dot_dimension_numbers<[1], [0], [0], [1], [0, 0, 1, 1], [], []>} : vector<16x32xf32>, vector<32x128xf32>, vector<16x128xf32> -> vector<16x128xf32>
    %221 = vector.broadcast %217 : vector<1x128xf32> to vector<16x128xf32>
    %222 = arith.addf %221, %220 : vector<16x128xf32>
    %223 = vector.extract_strided_slice %24 {offsets = [0, 0], sizes = [16, 32], strides = [1, 1]} : vector<16x128xf32> to vector<16x32xf32>
    %c552 = arith.constant 552 : index
    %c0_95 = arith.constant 0 : index
    %224 = vector.load %arg4[%c552, %c0_95] : memref<744x128xf32, #tpu.memory_space<vmem>>, vector<32x128xf32>
    %cst_96 = arith.constant dense<0.000000e+00> : vector<16x128xf32>
    %225 = tpu.matmul %223, %224, %cst_96 {dimension_numbers = #tpu.dot_dimension_numbers<[1], [0], [0], [1], [0, 0, 1, 1], [], []>} : vector<16x32xf32>, vector<32x128xf32>, vector<16x128xf32> -> vector<16x128xf32>
    %226 = arith.addf %222, %225 : vector<16x128xf32>
    %227 = vector.extract_strided_slice %6 {offsets = [0, 0], sizes = [16, 16], strides = [1, 1]} : vector<16x128xf32> to vector<16x16xf32>
    %c584 = arith.constant 584 : index
    %c0_97 = arith.constant 0 : index
    %228 = vector.load %arg4[%c584, %c0_97] : memref<744x128xf32, #tpu.memory_space<vmem>>, vector<16x128xf32>
    %cst_98 = arith.constant dense<0.000000e+00> : vector<16x128xf32>
    %229 = tpu.matmul %227, %228, %cst_98 {dimension_numbers = #tpu.dot_dimension_numbers<[1], [0], [0], [1], [0, 0, 1, 1], [], []>} : vector<16x16xf32>, vector<16x128xf32>, vector<16x128xf32> -> vector<16x128xf32>
    %230 = arith.addf %226, %229 : vector<16x128xf32>
    %c12 = arith.constant 12 : index
    %c0_99 = arith.constant 0 : index
    %231 = vector.load %arg5[%c12, %c0_99] : memref<16x128xf32, #tpu.memory_space<vmem>>, vector<1x128xf32>
    %232 = vector.extract_strided_slice %188 {offsets = [0, 0], sizes = [16, 32], strides = [1, 1]} : vector<16x128xf32> to vector<16x32xf32>
    %c600 = arith.constant 600 : index
    %c0_100 = arith.constant 0 : index
    %233 = vector.load %arg4[%c600, %c0_100] : memref<744x128xf32, #tpu.memory_space<vmem>>, vector<32x128xf32>
    %cst_101 = arith.constant dense<0.000000e+00> : vector<16x128xf32>
    %234 = tpu.matmul %232, %233, %cst_101 {dimension_numbers = #tpu.dot_dimension_numbers<[1], [0], [0], [1], [0, 0, 1, 1], [], []>} : vector<16x32xf32>, vector<32x128xf32>, vector<16x128xf32> -> vector<16x128xf32>
    %235 = vector.broadcast %231 : vector<1x128xf32> to vector<16x128xf32>
    %236 = arith.addf %235, %234 : vector<16x128xf32>
    %237 = vector.extract_strided_slice %24 {offsets = [0, 0], sizes = [16, 32], strides = [1, 1]} : vector<16x128xf32> to vector<16x32xf32>
    %c632 = arith.constant 632 : index
    %c0_102 = arith.constant 0 : index
    %238 = vector.load %arg4[%c632, %c0_102] : memref<744x128xf32, #tpu.memory_space<vmem>>, vector<32x128xf32>
    %cst_103 = arith.constant dense<0.000000e+00> : vector<16x128xf32>
    %239 = tpu.matmul %237, %238, %cst_103 {dimension_numbers = #tpu.dot_dimension_numbers<[1], [0], [0], [1], [0, 0, 1, 1], [], []>} : vector<16x32xf32>, vector<32x128xf32>, vector<16x128xf32> -> vector<16x128xf32>
    %240 = arith.addf %236, %239 : vector<16x128xf32>
    %241 = vector.extract_strided_slice %6 {offsets = [0, 0], sizes = [16, 16], strides = [1, 1]} : vector<16x128xf32> to vector<16x16xf32>
    %c664 = arith.constant 664 : index
    %c0_104 = arith.constant 0 : index
    %242 = vector.load %arg4[%c664, %c0_104] : memref<744x128xf32, #tpu.memory_space<vmem>>, vector<16x128xf32>
    %cst_105 = arith.constant dense<0.000000e+00> : vector<16x128xf32>
    %243 = tpu.matmul %241, %242, %cst_105 {dimension_numbers = #tpu.dot_dimension_numbers<[1], [0], [0], [1], [0, 0, 1, 1], [], []>} : vector<16x16xf32>, vector<16x128xf32>, vector<16x128xf32> -> vector<16x128xf32>
    %244 = arith.addf %240, %243 : vector<16x128xf32>
    %cst_106 = arith.constant dense<0.000000e+00> : vector<16x16xf32>
    %245 = tpu.matmul %202, %216, %cst_106 {dimension_numbers = #tpu.dot_dimension_numbers<[1], [1], [0], [0], [0, 0, 1, 0], [], []>} : vector<16x128xf32>, vector<16x128xf32>, vector<16x16xf32> -> vector<16x16xf32>
    %cst_107 = arith.constant 0.176776692 : f32
    %246 = vector.broadcast %cst_107 : f32 to vector<16x16xf32>
    %247 = arith.mulf %245, %246 : vector<16x16xf32>
    %248 = arith.addf %247, %5 : vector<16x16xf32>
    %cst_108 = arith.constant dense<0xFF800000> : vector<16xf32>
    %249 = vector.multi_reduction <maximumf>, %248, %cst_108 [1] : vector<16x16xf32> to vector<16xf32>
    %250 = vector.shape_cast %249 : vector<16xf32> to vector<16x1xf32>
    %251 = vector.broadcast %250 : vector<16x1xf32> to vector<16x16xf32>
    %252 = arith.subf %248, %251 : vector<16x16xf32>
    %253 = math.exp %252 : vector<16x16xf32>
    %254 = arith.mulf %253, %0 : vector<16x16xf32>
    %cst_109 = arith.constant dense<0.000000e+00> : vector<16xf32>
    %255 = vector.multi_reduction <add>, %254, %cst_109 [1] : vector<16x16xf32> to vector<16xf32>
    %256 = vector.shape_cast %255 : vector<16xf32> to vector<16x1xf32>
    %cst_110 = arith.constant 0.000000e+00 : f32
    %257 = vector.broadcast %cst_110 : f32 to vector<16x1xf32>
    %258 = arith.cmpf ogt, %256, %257 : vector<16x1xf32>
    %cst_111 = arith.constant 1.000000e+00 : f32
    %259 = vector.broadcast %cst_111 : f32 to vector<16x1xf32>
    %260 = arith.select %258, %256, %259 : vector<16x1xi1>, vector<16x1xf32>
    %261 = vector.broadcast %260 : vector<16x1xf32> to vector<16x16xf32>
    %262 = arith.divf %254, %261 : vector<16x16xf32>
    %cst_112 = arith.constant dense<0.000000e+00> : vector<16x128xf32>
    %263 = tpu.matmul %262, %230, %cst_112 {dimension_numbers = #tpu.dot_dimension_numbers<[1], [0], [0], [1], [0, 0, 1, 1], [], []>} : vector<16x16xf32>, vector<16x128xf32>, vector<16x128xf32> -> vector<16x128xf32>
    %264 = arith.addf %263, %244 : vector<16x128xf32>
    %c0_113 = arith.constant 0 : index
    %c0_114 = arith.constant 0 : index
    %265 = vector.load %arg7[%c0_113, %c0_114] : memref<16x128xf32, #tpu.memory_space<vmem>>, vector<16x128xf32>
    tpu.vector_store %arg7[%c0_113, %c0_114], %264 {strides = array<i32>} : memref<16x128xf32, #tpu.memory_space<vmem>>, vector<16x128xf32>,
    %c0_115 = arith.constant 0 : index
    %266 = memref.load %arg0[%c0_115] : memref<1xi32, #tpu.memory_space<smem>>
    %267 = arith.index_cast %266 : i32 to index
    %c0_116 = arith.constant 0 : index
    %268 = vector.load %arg7[%267, %c0_116] : memref<16x128xf32, #tpu.memory_space<vmem>>, vector<1x128xf32>
    %269 = vector.extract_strided_slice %268 {offsets = [0, 0], sizes = [1, 32], strides = [1, 1]} : vector<1x128xf32> to vector<1x32xf32>
    %c680 = arith.constant 680 : index
    %c0_117 = arith.constant 0 : index
    %270 = vector.load %arg4[%c680, %c0_117] : memref<744x128xf32, #tpu.memory_space<vmem>>, vector<32x128xf32>
    %cst_118 = arith.constant dense<0.000000e+00> : vector<1x128xf32>
    %271 = tpu.matmul %269, %270, %cst_118 {dimension_numbers = #tpu.dot_dimension_numbers<[1], [0], [0], [1], [0, 0, 1, 1], [], []>} : vector<1x32xf32>, vector<32x128xf32>, vector<1x128xf32> -> vector<1x128xf32>
    %c13 = arith.constant 13 : index
    %c0_119 = arith.constant 0 : index
    %272 = vector.load %arg5[%c13, %c0_119] : memref<16x128xf32, #tpu.memory_space<vmem>>, vector<1x128xf32>
    %273 = arith.addf %271, %272 : vector<1x128xf32>
    %cst_120 = arith.constant 0.000000e+00 : f32
    %274 = vector.broadcast %cst_120 : f32 to vector<1x128xf32>
    %275 = arith.cmpf oge, %273, %274 : vector<1x128xf32>
    %cst_121 = arith.constant 0.00999999977 : f32
    %276 = vector.broadcast %cst_121 : f32 to vector<1x128xf32>
    %277 = arith.mulf %276, %273 : vector<1x128xf32>
    %278 = arith.select %275, %273, %277 : vector<1x128xi1>, vector<1x128xf32>
    %279 = vector.extract_strided_slice %278 {offsets = [0, 0], sizes = [1, 32], strides = [1, 1]} : vector<1x128xf32> to vector<1x32xf32>
    %c712 = arith.constant 712 : index
    %c0_122 = arith.constant 0 : index
    %280 = vector.load %arg4[%c712, %c0_122] : memref<744x128xf32, #tpu.memory_space<vmem>>, vector<32x128xf32>
    %cst_123 = arith.constant dense<0.000000e+00> : vector<1x128xf32>
    %281 = tpu.matmul %279, %280, %cst_123 {dimension_numbers = #tpu.dot_dimension_numbers<[1], [0], [0], [1], [0, 0, 1, 1], [], []>} : vector<1x32xf32>, vector<32x128xf32>, vector<1x128xf32> -> vector<1x128xf32>
    %c14 = arith.constant 14 : index
    %c0_124 = arith.constant 0 : index
    %282 = vector.load %arg5[%c14, %c0_124] : memref<16x128xf32, #tpu.memory_space<vmem>>, vector<1x128xf32>
    %283 = arith.addf %281, %282 : vector<1x128xf32>
    %cst_125 = arith.constant dense<0xFF800000> : vector<1xf32>
    %284 = vector.multi_reduction <maximumf>, %283, %cst_125 [1] : vector<1x128xf32> to vector<1xf32>
    %285 = vector.shape_cast %284 : vector<1xf32> to vector<1x1xf32>
    %286 = vector.broadcast %285 : vector<1x1xf32> to vector<1x128xf32>
    %287 = arith.subf %283, %286 : vector<1x128xf32>
    %288 = math.exp %287 : vector<1x128xf32>
    %cst_126 = arith.constant dense<0.000000e+00> : vector<1xf32>
    %289 = vector.multi_reduction <add>, %288, %cst_126 [1] : vector<1x128xf32> to vector<1xf32>
    %290 = vector.shape_cast %289 : vector<1xf32> to vector<1x1xf32>
    %291 = math.log %290 : vector<1x1xf32>
    %292 = arith.addf %291, %285 : vector<1x1xf32>
    %293 = vector.broadcast %292 : vector<1x1xf32> to vector<1x128xf32>
    %294 = arith.subf %283, %293 : vector<1x128xf32>
    %295 = vector.shape_cast %294 : vector<1x128xf32> to vector<1x128xf32>
    %296 = vector.broadcast %295 : vector<1x128xf32> to vector<8x128xf32>
    %c0_127 = arith.constant 0 : index
    %c0_128 = arith.constant 0 : index
    %297 = vector.load %arg6[%c0_127, %c0_128] : memref<8x128xf32, #tpu.memory_space<vmem>>, vector<8x128xf32>
    tpu.vector_store %arg6[%c0_127, %c0_128], %296 {strides = array<i32>} : memref<8x128xf32, #tpu.memory_space<vmem>>, vector<8x128xf32>,
    return
  }
}

</mosaic_0001>

<bundles_post_ra>
// kernel: forward.1
= control target key start
LH: loop header
LB: loop body
LE: loop exit
PB: predicated region body
PF: predicated region fallthrough
CT: control target
= control target key end

     0   :  { %vm40_vm0 = vcmask 64512   ;;  %vm137_vm3 = vcmask 261120   ;;  %vm313_vm4 = vcmask 130048   ;;  %s4217_s20 = smov 96   ;;  %s4220_s27 = smov 32   ;;  %s4856_s4 = inlined_call_operand.vmem [shape: f32[744,128], index: 4, kind: input, shape index: {}]   ;;  %s4857_s1 = inlined_call_operand.vmem [shape: f32[16,128], index: 1, kind: input, shape index: {}]   ;;  %s4858_s5 = inlined_call_operand.vmem [shape: f32[16,128], index: 5, kind: input, shape index: {}]   ;;  %s4859_s3 = inlined_call_operand.vmem [shape: f32[16,128], index: 3, kind: input, shape index: {}]   ;;  %s4860_s2 = inlined_call_operand.vmem [shape: f32[16,16], index: 2, kind: input, shape index: {}]   ;;  %s4861_s0 = inlined_call_operand.<no memory space> [shape: s32[1], index: 0, kind: input, shape index: {}]   ;;  %s4862_s6 = inlined_call_operand.vmem [shape: f32[8,128], index: 6, kind: output, shape index: {}]  }
   0x1   :  { %v34_v0 = vld [vmem:[%s4856_s4] sm:$0xff]  ;;  %v33_v2 = vld [vmem:[%s4857_s1 + $0x8] sm:$0xff]  ;;  %v129_v4 = vld [vmem:[%s4856_s4 + $0x10] sm:$0xff]  ;;  %s3080_s18 = scalar_lea.vmem [#allocation2], %s4861_s0 }
   0x2   :  { %v32_v1 = vld [vmem:[%s4857_s1] sm:$0xff]  ;;  %3531 = vmatprep.subr.mxu1 %v34_v0  ;;  %v128_v3 = vld [vmem:[%s4856_s4 + $0x8] sm:$0xff]  ;;  %v130_v6 = vld [vmem:[%s4856_s4 + $0x18] sm:$0xff] }
   0x3   :  { %3533 = vmatprep.mubr.msk.f32.mxu1 %vm40_vm0, %v32_v1  ;;  %3532 = vmatpush3.msra.mxu1 %v34_v0  ;;  %v3862_v5 = vpack.c.bf16 %v129_v4, %v128_v3  ;;  %v131_v7 = vld [vmem:[%s4856_s4 + $0x20] sm:$0xff]  ;;  %v220_v9 = vld [vmem:[%s4856_s4 + $0x28] sm:$0xff]  ;;  %v221_v10 = vld [vmem:[%s4856_s4 + $0x30] sm:$0xff] }
   0x4   :  { %3534 = vmatmul.mubr.msk.f32.vlgmr.msra.gmra.mrb[0].mxu1 %vm40_vm0, %v33_v2  ;;  %v3866_v8 = vpack.c.bf16 %v131_v7, %v130_v6  ;;  %v398_v11 = vld [vmem:[%s4856_s4 + $0x58] sm:$0xff]  ;;  %v3870_v12 = vpack.c.bf16 %v221_v10, %v220_v9  ;;  %v399_v13 = vld [vmem:[%s4856_s4 + $0x60] sm:$0xff]  ;;  %v400_v26 = vld [vmem:[%s4856_s4 + $0x68] sm:$0xff]  ;;  %vm1750_vm0 = vcmask 523264  }
   0x5   :  { %3863 = vmatprep.subr.bf16.mxu1 %v3862_v5  ;;  %v3882_v14 = vpack.c.bf16 %v399_v13, %v398_v11  ;;  %v3265_v15 = vld [vmem:[%s4858_s5] ss:$0 sm:$0xff]  ;;  %v222_v24 = vld [vmem:[%s4856_s4 + $0x38] sm:$0xff]  ;;  %v401_v28 = vld [vmem:[%s4856_s4 + $0x70] sm:$0xff] }
   0x6   :  { %3865 = vmatpush3.bf16.msra.mxu1 %v3862_v5  ;;  %3871 = vmatprep.subr.bf16.mxu0 %v3870_v12  ;;  %v223_v25 = vld [vmem:[%s4856_s4 + $0x40] sm:$0xff]  ;;  %v3886_v29 = vpack.c.bf16 %v401_v28, %v400_v26  ;;  %v483_v30 = vld [vmem:[%s4856_s4 + $0x78] sm:$0xff]  ;;  %v311_v32 = vld [vmem:[%s4856_s4 + $0x48] sm:$0xff]  ;;  %v4218_v28 = vmov -1e+30  }
   0x7   :  { %3867 = vmatprep.subr.bf16.mxu1 %v3866_v8  ;;  %3873 = vmatpush3.bf16.msra.mxu0 %v3870_v12  ;;  %v3874_v27 = vpack.c.bf16 %v223_v25, %v222_v24  ;;  %v484_v31 = vld [vmem:[%s4856_s4 + $0x80] sm:$0xff]  ;;  %v312_v34 = vld [vmem:[%s4856_s4 + $0x50] sm:$0xff]  ;;  %v563_v38 = vld [vmem:[%s4856_s4 + $0x88] sm:$0xff] }
   0x8   :  { %v3890_v33 = vpack.c.bf16 %v484_v31, %v483_v30  ;;  %v3878_v35 = vpack.c.bf16 %v312_v34, %v311_v32  ;;  %v3268_v36 = vld [vmem:[%s4858_s5 + $0x1] ss:$0 sm:$0xff]  ;;  %v564_v40 = vld [vmem:[%s4856_s4 + $0x90] sm:$0xff]  ;;  %v728_v41 = vld [vmem:[%s4856_s4 + $0xb8] sm:$0xff] }
   0x9   :  { %3875 = vmatprep.subr.bf16.mxu0 %v3874_v27  ;;  %v729_v42 = vld [vmem:[%s4856_s4 + $0xc0] sm:$0xff]  ;;  %v3894_v46 = vpack.c.bf16 %v564_v40, %v563_v38  ;;  %v565_v48 = vld [vmem:[%s4856_s4 + $0x98] sm:$0xff]  ;;  %v730_v50 = vld [vmem:[%s4856_s4 + $0xc8] sm:$0xff] }
   0xa   :  { %3869 = vmatpush3.bf16.msra.mxu1 %v3866_v8  ;;  %v4347_v45 = vld [vmem:[%s4859_s3] sm:$0xff]  ;;  %v3906_v47 = vpack.c.bf16 %v729_v42, %v728_v41  ;;  %v731_v51 = vld [vmem:[%s4856_s4 + $0xd0] sm:$0xff]  ;;  %v4372_v52 = vld [vmem:[%s4859_s3 + $0x8] sm:$0xff] }
   0xb   :  { %3883 = vmatprep.subr.bf16.mxu1 %v3882_v14  ;;  %3877 = vmatpush3.bf16.msra.mxu0 %v3874_v27  ;;  %v566_v49 = vld [vmem:[%s4856_s4 + $0xa0] sm:$0xff]  ;;  %v648_v53 = vld [vmem:[%s4856_s4 + $0xa8] sm:$0xff]  ;;  %v3910_v55 = vpack.c.bf16 %v731_v51, %v730_v50  ;;  %v649_v56 = vld [vmem:[%s4856_s4 + $0xb0] sm:$0xff] }
   0xc   :  { %3879 = vmatprep.subr.bf16.mxu0 %v3878_v35  ;;  %v3898_v54 = vpack.c.bf16 %v566_v49, %v565_v48  ;;  %v813_v57 = vld [vmem:[%s4856_s4 + $0xd8] sm:$0xff]  ;;  %v814_v58 = vld [vmem:[%s4856_s4 + $0xe0] sm:$0xff]  ;;  %v3902_v59 = vpack.c.bf16 %v649_v56, %v648_v53  ;;  %vm4420_vm5 = vmpackc.low %vm137_vm3, %vm137_vm3 }
   0xd   :  { %v3914_v60 = vpack.c.bf16 %v814_v58, %v813_v57  ;;  %v3273_v61 = vld [vmem:[%s4858_s5 + $0x2] ss:$0 sm:$0xff]  ;;  %v3278_v62 = vld [vmem:[%s4858_s5 + $0x3] ss:$0 sm:$0xff]  ;;  %v3283_v10 = vld [vmem:[%s4858_s5 + $0x4] ss:$0 sm:$0xff] }
   0xe   :  { %v4456_v25 = vld [vmem:[%s4860_s2 + $0x8] sm:$0xff]  ;;  %v4461_v26 = vld [vmem:[%s4860_s2] sm:$0xff]  ;;  %s4219_s2 = smov 64  }
   0xf   :  { %vm27_vm6 = vcmp.gt.f32.partialorder %v4456_v25, 0.0  ;;  %vm26_vm7 = vcmp.gt.f32.partialorder %v4461_v26, 0.0 }
  0x10   :  { %v4467_v32 = vsel %vm26_vm7, 0.0, %v4218_v28 }
  0xd7   :  { %v3535_v16 = vpop.f32.mrb[0].mxu1 }
  0xd8   :  { %v119_v17 = vadd.f32 %v3535_v16, %v3265_v15  ;;  %v113_v18 = vpop.f32.mrb[1].mxu1 }
  0xd9   :  { %v114_v19 = vadd.f32 %v3265_v15, %v113_v18 }
  0xda   :  { %v125_v20 = vmul.f32 0.01, %v119_v17  ;;  %vm123_vm1 = vcmp.ge.f32.partialorder %v119_v17, 0.0 }
  0xdb   :  { %vm122_vm2 = vcmp.ge.f32.partialorder %v114_v19, 0.0  ;;  %v124_v21 = vmul.f32 0.01, %v114_v19 }
  0xdc   :  { %v127_v23 = vsel %vm123_vm1, %v119_v17, %v125_v20  ;;  %vm1753_vm1 = vcmask 785408  }
  0xdd   :  { %v126_v22 = vsel %vm122_vm2, %v114_v19, %v124_v21 }
  0xde   :  { %3544 = vmatprep.mubr.msk.f32.mxu1 %vm137_vm3, %v126_v22 }
  0xdf   :  { %3545 = vmatmul.mubr.msk.f32.vlgmr.msra.gmra.mrb[2].mxu1 %vm137_vm3, %v127_v23 }
  0xe0   :  { %3885 = vmatpush3.bf16.msra.mxu1 %v3882_v14 }
  0xe1   :  { %3887 = vmatprep.subr.bf16.mxu1 %v3886_v29 }
  0xe4   :  { %3889 = vmatpush3.bf16.msra.mxu1 %v3886_v29  ;;  %v4465_v29 = vsel %vm27_vm6, 0.0, %v4218_v28 }
  0xe5   :  { %3891 = vmatprep.subr.bf16.mxu1 %v3890_v33 }
 0x1b2   :  { %v3546_v37 = vpop.f32.mrb[2].mxu1 }
 0x1b3   :  { %v210_v39 = vpop.f32.mrb[3].mxu1  ;;  %v4338_v44 = vadd.f32 %v3546_v37, %v3268_v36 }
 0x1b4   :  { %v4336_v43 = vadd.f32 %v3268_v36, %v210_v39 }
 0x1b6   :  { %3555 = vmatprep.mubr.msk.f32.mxu0 %vm137_vm3, %v4336_v43  ;;  %3573 = vmatprep.mubr.msk.f32.mxu1 %vm137_vm3, %v4336_v43 }
 0x1b7   :  { %3556 = vmatmul.mubr.msk.f32.vlgmr.msra.gmra.mrb[0].mxu0 %vm137_vm3, %v4338_v44  ;;  %3574 = vmatmul.mubr.msk.f32.vlgmr.msra.gmra.mrb[4].mxu1 %vm137_vm3, %v4338_v44 }
 0x1b8   :  { %3893 = vmatpush3.bf16.msra.mxu1 %v3890_v33  ;;  %3881 = vmatpush3.bf16.msra.mxu0 %v3878_v35 }
 0x1b9   :  { %3562 = vmatprep.mubr.msk.f32.mxu0 %vm313_vm4, %v4347_v45  ;;  %3580 = vmatprep.mubr.msk.f32.mxu1 %vm313_vm4, %v4347_v45 }
 0x1ba   :  { %3895 = vmatprep.subr.bf16.mxu0 %v3894_v46  ;;  %3907 = vmatprep.subr.bf16.mxu1 %v3906_v47 }
 0x1bf   :  { %3563 = vmatmul.mubr.msk.f32.vlgmr.msra.gmra.mrb[0].mxu0 %vm313_vm4, %v4372_v52  ;;  %3581 = vmatmul.mubr.msk.f32.vlgmr.msra.gmra.mrb[4].mxu1 %vm313_vm4, %v4372_v52 }
 0x1c0   :  { %3897 = vmatpush3.bf16.msra.mxu0 %v3894_v46  ;;  %3909 = vmatpush3.bf16.msra.mxu1 %v3906_v47 }
 0x1c1   :  { %3591 = vmatprep.mubr.msk.f32.mxu0 %vm137_vm3, %v4336_v43  ;;  %3609 = vmatprep.mubr.msk.f32.mxu1 %vm137_vm3, %v4336_v43 }
 0x1c2   :  { %3899 = vmatprep.subr.bf16.mxu0 %v3898_v54  ;;  %3911 = vmatprep.subr.bf16.mxu1 %v3910_v55 }
 0x1c4   :  { %3901 = vmatpush3.bf16.msra.mxu0 %v3898_v54  ;;  %3913 = vmatpush3.bf16.msra.mxu1 %v3910_v55 }
 0x1c5   :  { %3903 = vmatprep.subr.bf16.mxu0 %v3902_v59  ;;  %3915 = vmatprep.subr.bf16.mxu1 %v3914_v60 }
 0x1c7   :  { %3592 = vmatmul.mubr.msk.f32.vlgmr.msra.gmra.mrb[2].mxu0 %vm137_vm3, %v4338_v44  ;;  %3610 = vmatmul.mubr.msk.f32.vlgmr.msra.gmra.mrb[6].mxu1 %vm137_vm3, %v4338_v44 }
 0x1c8   :  { %3905 = vmatpush3.bf16.msra.mxu0 %v3902_v59  ;;  %3917 = vmatpush3.bf16.msra.mxu1 %v3914_v60 }
 0x1c9   :  { %3598 = vmatprep.mubr.msk.f32.mxu0 %vm313_vm4, %v4347_v45  ;;  %3616 = vmatprep.mubr.msk.f32.mxu1 %vm313_vm4, %v4347_v45 }
 0x1cf   :  { %3599 = vmatmul.mubr.msk.f32.vlgmr.msra.gmra.mrb[2].mxu0 %vm313_vm4, %v4372_v52  ;;  %3617 = vmatmul.mubr.msk.f32.vlgmr.msra.gmra.mrb[6].mxu1 %vm313_vm4, %v4372_v52 }
 0x292   :  { %v3564_v63 = vpop.f32.mrb[0].mxu0  ;;  %v3582_v0 = vpop.f32.mrb[4].mxu1 }
 0x293   :  { %v4412_v1 = vadd.f32 %v3564_v63, %v3273_v61  ;;  %v4092_v2 = vadd.f32 %v3582_v0, %v3278_v62  ;;  %v386_v3 = vpop.f32.mrb[1].mxu0  ;;  %v551_v4 = vpop.f32.mrb[5].mxu1 }
 0x294   :  { %v4414_v5 = vadd.f32 %v3273_v61, %v386_v3  ;;  %v4093_v6 = vadd.f32 %v3278_v62, %v551_v4 }
 0x295   :  { %1094 = vrot.lane.b32.xlu1 %v4412_v1, %s4217_s20 }
 0x296   :  { %3623 = vmatprep.mubr.msk.f32.mxu0 %vm137_vm3, %v4414_v5  ;;  %v4426_v8 = vpack.i.bf16 %v4092_v2, %v4093_v6  ;;  %v3918_v9 = vpack.c.bf16 %v4092_v2, %v4093_v6 }
 0x298   :  { %4140 = vrot.lane.b32.xlu0 %v4426_v8, %s4217_s20  ;;  %3920 = vmatprep.subr.msk.bf16.mxu0 %vm4420_vm5, %v3918_v9 }
 0x299   :  { %3923 = vmatpush3.bf16.xpose.msk.msra.mxu0 %vm4420_vm5, %v3918_v9 }
 0x29c   :  { %1092 = vrot.lane.b32.xlu0 %v4414_v5, %s4217_s20 }
 0x2a0   :  { %3624 = vmatmul.mubr.msk.f32.vlgmr.msra.gmra.mrb[4].mxu0 %vm137_vm3, %v4412_v1 }
 0x2a2   :  { %v3600_v11 = vpop.f32.mrb[2].mxu0  ;;  %v4441_v12 = vpop.f32.mrb[6].mxu1 }
 0x2a3   :  { %v4094_v13 = vadd.f32 %v3600_v11, %v3283_v10  ;;  %v716_v14 = vpop.f32.mrb[3].mxu0  ;;  %v4443_v15 = vpop.f32.mrb[7].mxu1 }
 0x2a4   :  { %v4095_v16 = vadd.f32 %v3283_v10, %v716_v14 }
 0x2a6   :  { %v3924_v17 = vpack.c.bf16 %v4094_v13, %v4095_v16  ;;  %v4445_v18 = vpack.i.bf16 %v4094_v13, %v4095_v16 }
 0x2a8   :  { %3925 = vmatprep.subr.bf16.mxu1 %v3924_v17 }
 0x2a9   :  { %3927 = vmatpush3.bf16.msra.mxu1 %v3924_v17 }
 0x307   :  { %v1095_v24 = vpop.permute.xlu1 %1094 }
 0x30a   :  { %v4141_v19 = vpop.permute.xlu0 %4140 }
 0x30b   :  { %v4143_v20 = vunpack.i.h.bf16 %v4141_v19  ;;  %v4142_v21 = vunpack.i.l.bf16 %v4141_v19 }
 0x30d   :  { %v3928_v22 = vpack.c.bf16 %v4143_v20, %v4142_v21 }
 0x30e   :  { %v1093_v23 = vpop.permute.xlu0 %1092 }
 0x30f   :  { %3930 = vmatprep.subr.msk.bf16.mxu0 %vm4420_vm5, %v3928_v22  ;;  %3637 = vmatprep.mubr.msk.f32.mxu0 %vm137_vm3, %v1093_v23 }
 0x310   :  { %3933 = vmatpush3.bf16.xpose.msk.msra.mxu0 %vm4420_vm5, %v3928_v22 }
 0x317   :  { %3638 = vmatmul.mubr.msk.f32.vlgmr.msra.gmra.mrb[6].mxu0 %vm137_vm3, %v1095_v24 }
 0x373   :  { %v3625_v27 = vpop.f32.mrb[4].mxu0 }
 0x374   :  { %v980_v30 = vmul.f32 0.17677669, %v3625_v27  ;;  %v970_v31 = vpop.f32.mrb[5].mxu0 }
 0x375   :  { %v979_v33 = vmul.f32 0.17677669, %v970_v31 }
 0x376   :  { %v982_v34 = vadd.f32 %v980_v30, %v4465_v29 }
 0x377   :  { %v981_v35 = vadd.f32 %v979_v33, %v4467_v32 }
 0x378   :  { %v986_v36 = vsel %vm313_vm4, %v982_v34, -inf }
 0x379   :  { %987 = vmax.xlane.f32.xlu0 %v986_v36  ;;  %v983_v37 = vsel %vm313_vm4, %v981_v35, -inf }
 0x37a   :  { %984 = vmax.xlane.f32.xlu1 %v983_v37 }
 0x3ea   :  { %v3639_v38 = vpop.f32.mrb[6].mxu0 }
 0x3eb   :  { %v1184_v39 = vmul.f32 0.17677669, %v3639_v38  ;;  %v1174_v40 = vpop.f32.mrb[7].mxu0 }
 0x3ec   :  { %v1183_v41 = vmul.f32 0.17677669, %v1174_v40 }
 0x3ed   :  { %v1186_v42 = vadd.f32 %v1184_v39, %v4465_v29 }
 0x3ee   :  { %v1185_v46 = vadd.f32 %v1183_v41, %v4467_v32 }
 0x3ef   :  { %v1190_v47 = vsel %vm313_vm4, %v1186_v42, -inf }
 0x3f0   :  { %1191 = vmax.xlane.f32.xlu1 %v1190_v47  ;;  %v1187_v48 = vsel %vm313_vm4, %v1185_v46, -inf }
 0x3f1   :  { %1188 = vmax.xlane.f32.xlu0 %v1187_v48 }
 0x406   :  { %v988_v49 = vpop.xlane.xlu0 %987 }
 0x407   :  { %v990_v50 = vsub.f32 %v982_v34, %v988_v49  ;;  %v985_v51 = vpop.xlane.xlu1 %984 }
 0x408   :  { %v989_v53 = vsub.f32 %v981_v35, %v985_v51 }
 0x409   :  { %v993_v54 = vmul.f32 1.442695, %v990_v50 }
 0x40a   :  { %v991_v55 = vmul.f32 1.442695, %v989_v53 }
 0x40b   :  { %4169 = vpow2.f32 %v993_v54 }
 0x40c   :  { %4171 = vpow2.f32 %v991_v55 }
 0x415   :  { %v4170_v56 = vpop.eup %4169 }
 0x416   :  { %v4172_v57 = vpop.eup %4171  ;;  %v996_v58 = vmul.f32 %v4170_v56, %v4456_v25 }
 0x417   :  { %v995_v59 = vmul.f32 %v4172_v57, %v4461_v26 }
 0x418   :  { %v1000_v60 = vsel %vm313_vm4, %v996_v58, 0.0 }
 0x419   :  { %1001 = vadd.xlane.f32.xlu1 %v1000_v60  ;;  %v997_v61 = vsel %vm313_vm4, %v995_v59, 0.0 }
 0x41a   :  { %998 = vadd.xlane.f32.xlu0 %v997_v61 }
 0x47d   :  { %v1192_v62 = vpop.xlane.xlu1 %1191 }
 0x47e   :  { %v1194_v63 = vsub.f32 %v1186_v42, %v1192_v62  ;;  %v1189_v0 = vpop.xlane.xlu0 %1188 }
 0x47f   :  { %v1193_v2 = vsub.f32 %v1185_v46, %v1189_v0 }
 0x480   :  { %v1197_v3 = vmul.f32 1.442695, %v1194_v63 }
 0x481   :  { %v1195_v4 = vmul.f32 1.442695, %v1193_v2 }
 0x482   :  { %4173 = vpow2.f32 %v1197_v3 }
 0x483   :  { %4175 = vpow2.f32 %v1195_v4 }
 0x48c   :  { %v4174_v6 = vpop.eup %4173 }
 0x48d   :  { %v4176_v9 = vpop.eup %4175  ;;  %v1200_v10 = vmul.f32 %v4174_v6, %v4456_v25 }
 0x48e   :  { %v1199_v11 = vmul.f32 %v4176_v9, %v4461_v26 }
 0x48f   :  { %v1204_v13 = vsel %vm313_vm4, %v1200_v10, 0.0 }
 0x490   :  { %1205 = vadd.xlane.f32.xlu1 %v1204_v13  ;;  %v1201_v14 = vsel %vm313_vm4, %v1199_v11, 0.0 }
 0x491   :  { %1202 = vadd.xlane.f32.xlu0 %v1201_v14 }
 0x4a1   :  { %4150 = vrot.lane.b32.xlu1 %v4426_v8, %s4219_s2 }
 0x4a5   :  { %1304 = vrot.lane.b32.xlu1 %v4414_v5, %s4219_s2 }
 0x4a6   :  { %v1002_v16 = vpop.xlane.xlu1 %1001 }
 0x4a7   :  { %vm1004_vm8 = vcmp.gt.f32.partialorder %v1002_v16, 0.0  ;;  %4145 = vrot.lane.b32.xlu0 %v4445_v18, %s4217_s20  ;;  %v999_v17 = vpop.xlane.xlu0 %998 }
 0x4a8   :  { %v1006_v19 = vsel %vm1004_vm8, %v1002_v16, 1.0  ;;  %vm1003_vm9 = vcmp.gt.f32.partialorder %v999_v17, 0.0 }
 0x4a9   :  { %4177 = vrcp.f32 %v1006_v19  ;;  %v1005_v20 = vsel %vm1003_vm9, %v999_v17, 1.0  ;;  %vm3241_vm9 = vcmask 1040384  }
 0x4aa   :  { %4179 = vrcp.f32 %v1005_v20 }
 0x4ab   :  { %1306 = vrot.lane.b32.xlu0 %v4412_v1, %s4219_s2 }
 0x4b3   :  { %v4178_v21 = vpop.eup %4177 }
 0x4b4   :  { %v4180_v22 = vpop.eup %4179  ;;  %v1010_v24 = vmul.f32 %v4178_v21, %v996_v58 }
 0x4b5   :  { %v1008_v23 = vmul.f32 %v4180_v22, %v995_v59 }
 0x4b7   :  { %3630 = vmatprep.mubr.msk.f32.mxu1 %vm313_vm4, %v1008_v23 }
 0x4b8   :  { %3631 = vmatmul.mubr.msk.f32.vlgmr.msra.gmra.mrb[8].mxu1 %vm313_vm4, %v1010_v24 }
 0x51d   :  { %v1206_v27 = vpop.xlane.xlu1 %1205 }
 0x51e   :  { %vm1208_vm10 = vcmp.gt.f32.partialorder %v1206_v27, 0.0  ;;  %v1203_v28 = vpop.xlane.xlu0 %1202 }
 0x51f   :  { %v1210_v30 = vsel %vm1208_vm10, %v1206_v27, 1.0  ;;  %vm1207_vm11 = vcmp.gt.f32.partialorder %v1203_v28, 0.0 }
 0x520   :  { %4181 = vrcp.f32 %v1210_v30  ;;  %v1209_v31 = vsel %vm1207_vm11, %v1203_v28, 1.0 }
 0x521   :  { %4183 = vrcp.f32 %v1209_v31  ;;  %v4151_v33 = vpop.permute.xlu1 %4150 }
 0x522   :  { %v4146_v34 = vpop.permute.xlu0 %4145  ;;  %v4153_v35 = vunpack.i.h.bf16 %v4151_v33  ;;  %v4152_v36 = vunpack.i.l.bf16 %v4151_v33 }
 0x523   :  { %v4148_v37 = vunpack.i.h.bf16 %v4146_v34  ;;  %v4147_v38 = vunpack.i.l.bf16 %v4146_v34 }
 0x524   :  { %v3938_v40 = vpack.c.bf16 %v4153_v35, %v4152_v36 }
 0x525   :  { %v3934_v39 = vpack.c.bf16 %v4148_v37, %v4147_v38  ;;  %v1305_v48 = vpop.permute.xlu1 %1304 }
 0x526   :  { %v1307_v49 = vpop.permute.xlu0 %1306 }
 0x527   :  { %3935 = vmatprep.subr.bf16.mxu1 %v3934_v39 }
 0x528   :  { %3937 = vmatpush3.bf16.msra.mxu1 %v3934_v39 }
 0x529   :  { %3940 = vmatprep.subr.msk.bf16.mxu1 %vm4420_vm5, %v3938_v40 }
 0x52a   :  { %v4182_v41 = vpop.eup %4181 }
 0x52b   :  { %v4184_v42 = vpop.eup %4183  ;;  %v1214_v47 = vmul.f32 %v4182_v41, %v1200_v10 }
 0x52c   :  { %v1212_v46 = vmul.f32 %v4184_v42, %v1199_v11 }
 0x52e   :  { %3644 = vmatprep.mubr.msk.f32.mxu1 %vm313_vm4, %v1212_v46 }
 0x52f   :  { %3645 = vmatmul.mubr.msk.f32.vlgmr.msra.gmra.mrb[10].mxu1 %vm313_vm4, %v1214_v47 }
 0x530   :  { %3651 = vmatprep.mubr.msk.f32.mxu1 %vm137_vm3, %v1305_v48 }
 0x531   :  { %3943 = vmatpush3.bf16.xpose.msk.msra.mxu1 %vm4420_vm5, %v3938_v40 }
 0x538   :  { %3652 = vmatmul.mubr.msk.f32.vlgmr.msra.gmra.mrb[12].mxu1 %vm137_vm3, %v1307_v49 }
 0x58b   :  { %v4503_v50 = vpop.f32.mrb[8].mxu1 }
 0x58c   :  { %v4505_v51 = vpop.f32.mrb[9].mxu1 }
 0x602   :  { %v4507_v53 = vpop.f32.mrb[10].mxu1 }
 0x603   :  { %v4509_v54 = vpop.f32.mrb[11].mxu1 }
 0x60b   :  { %v3653_v55 = vpop.f32.mrb[12].mxu1 }
 0x60c   :  { %v1396_v56 = vmul.f32 0.17677669, %v3653_v55  ;;  %v1386_v57 = vpop.f32.mrb[13].mxu1 }
 0x60d   :  { %v1395_v58 = vmul.f32 0.17677669, %v1386_v57 }
 0x60e   :  { %v1398_v59 = vadd.f32 %v1396_v56, %v4465_v29 }
 0x60f   :  { %v1397_v60 = vadd.f32 %v1395_v58, %v4467_v32 }
 0x610   :  { %v1402_v61 = vsel %vm313_vm4, %v1398_v59, -inf }
 0x611   :  { %1403 = vmax.xlane.f32.xlu0 %v1402_v61  ;;  %v1399_v62 = vsel %vm313_vm4, %v1397_v60, -inf }
 0x612   :  { %1400 = vmax.xlane.f32.xlu1 %v1399_v62 }
 0x69e   :  { %v1404_v63 = vpop.xlane.xlu0 %1403 }
 0x69f   :  { %v1406_v0 = vsub.f32 %v1398_v59, %v1404_v63  ;;  %v1401_v2 = vpop.xlane.xlu1 %1400 }
 0x6a0   :  { %v1405_v3 = vsub.f32 %v1397_v60, %v1401_v2 }
 0x6a1   :  { %v1409_v4 = vmul.f32 1.442695, %v1406_v0 }
 0x6a2   :  { %v1407_v6 = vmul.f32 1.442695, %v1405_v3 }
 0x6a3   :  { %4185 = vpow2.f32 %v1409_v4 }
 0x6a4   :  { %4187 = vpow2.f32 %v1407_v6 }
 0x6ad   :  { %v4186_v9 = vpop.eup %4185 }
 0x6ae   :  { %v4188_v10 = vpop.eup %4187  ;;  %v1412_v11 = vmul.f32 %v4186_v9, %v4456_v25 }
 0x6af   :  { %v1411_v13 = vmul.f32 %v4188_v10, %v4461_v26 }
 0x6b0   :  { %v1416_v14 = vsel %vm313_vm4, %v1412_v11, 0.0 }
 0x6b1   :  { %1417 = vadd.xlane.f32.xlu1 %v1416_v14  ;;  %v1413_v16 = vsel %vm313_vm4, %v1411_v13, 0.0 }
 0x6b2   :  { %1414 = vadd.xlane.f32.xlu0 %v1413_v16 }
 0x6c2   :  { %4160 = vrot.lane.b32.xlu1 %v4426_v8, %s4220_s27 }
 0x6c6   :  { %1514 = vrot.lane.b32.xlu1 %v4414_v5, %s4220_s27 }
 0x6c8   :  { %4155 = vrot.lane.b32.xlu0 %v4445_v18, %s4219_s2 }
 0x6cc   :  { %1516 = vrot.lane.b32.xlu0 %v4412_v1, %s4220_s27 }
 0x73e   :  { %v1418_v17 = vpop.xlane.xlu1 %1417 }
 0x73f   :  { %vm1420_vm12 = vcmp.gt.f32.partialorder %v1418_v17, 0.0  ;;  %v1415_v19 = vpop.xlane.xlu0 %1414 }
 0x740   :  { %v1422_v20 = vsel %vm1420_vm12, %v1418_v17, 1.0  ;;  %vm1419_vm13 = vcmp.gt.f32.partialorder %v1415_v19, 0.0  ;;  %v1758_v17 = vld [vmem:[%s4856_s4 + $0xe8] sm:$0xff] }
 0x741   :  { %4189 = vrcp.f32 %v1422_v20  ;;  %v1421_v21 = vsel %vm1419_vm13, %v1415_v19, 1.0  ;;  %v1759_v19 = vld [vmem:[%s4856_s4 + $0xf0] sm:$0xff]  ;;  %v1760_v20 = vld [vmem:[%s4856_s4 + $0xf8] sm:$0xff] }
 0x742   :  { %4191 = vrcp.f32 %v1421_v21  ;;  %v4161_v22 = vpop.permute.xlu1 %4160  ;;  %v3958_v21 = vpack.c.bf16 %v1759_v19, %v1758_v17  ;;  %v1992_v17 = vld [vmem:[%s4856_s4 + $0x190] sm:$0xff]  ;;  %v2483_v19 = vld [vmem:[%s4856_s4 + $0x228] sm:$0xff] }
 0x743   :  { %v4156_v23 = vpop.permute.xlu0 %4155  ;;  %v4163_v8 = vunpack.i.h.bf16 %v4161_v22  ;;  %v4162_v24 = vunpack.i.l.bf16 %v4161_v22  ;;  %v1761_v22 = vld [vmem:[%s4856_s4 + $0x100] sm:$0xff] }
 0x744   :  { %v4158_v27 = vunpack.i.h.bf16 %v4156_v23  ;;  %v4157_v5 = vunpack.i.l.bf16 %v4156_v23  ;;  %v3962_v23 = vpack.c.bf16 %v1761_v22, %v1760_v20 }
 0x745   :  { %v3948_v30 = vpack.c.bf16 %v4163_v8, %v4162_v24  ;;  %v1762_v8 = vld [vmem:[%s4856_s4 + $0x108] sm:$0xff]  ;;  %v1763_v24 = vld [vmem:[%s4856_s4 + $0x110] sm:$0xff] }
 0x746   :  { %v3944_v28 = vpack.c.bf16 %v4158_v27, %v4157_v5  ;;  %v1515_v35 = vpop.permute.xlu1 %1514  ;;  %v3966_v27 = vpack.c.bf16 %v1763_v24, %v1762_v8  ;;  %v1764_v5 = vld [vmem:[%s4856_s4 + $0x118] sm:$0xff] }
 0x747   :  { %v1517_v36 = vpop.permute.xlu0 %1516 }
 0x748   :  { %3945 = vmatprep.subr.bf16.mxu0 %v3944_v28 }
 0x749   :  { %3947 = vmatpush3.bf16.msra.mxu0 %v3944_v28  ;;  %v1765_v28 = vld [vmem:[%s4856_s4 + $0x120] sm:$0xff] }
 0x74a   :  { %3950 = vmatprep.subr.msk.bf16.mxu0 %vm4420_vm5, %v3948_v30 }
 0x74b   :  { %v4190_v1 = vpop.eup %4189 }
 0x74c   :  { %v4192_v31 = vpop.eup %4191  ;;  %v1426_v34 = vmul.f32 %v4190_v1, %v1412_v11  ;;  %v1766_v1 = vld [vmem:[%s4856_s4 + $0x128] sm:$0xff] }
 0x74d   :  { %v1424_v33 = vmul.f32 %v4192_v31, %v1411_v13  ;;  %v1767_v31 = vld [vmem:[%s4856_s4 + $0x130] sm:$0xff] }
 0x74f   :  { %3658 = vmatprep.mubr.msk.f32.mxu0 %vm313_vm4, %v1424_v33  ;;  %v3974_v33 = vpack.c.bf16 %v1767_v31, %v1766_v1 }
 0x750   :  { %3659 = vmatmul.mubr.msk.f32.vlgmr.msra.gmra.mrb[8].mxu0 %vm313_vm4, %v1426_v34  ;;  %v1768_v34 = vld [vmem:[%s4856_s4 + $0x138] sm:$0xff] }
 0x751   :  { %3665 = vmatprep.mubr.msk.f32.mxu0 %vm137_vm3, %v1515_v35  ;;  %v1769_v35 = vld [vmem:[%s4856_s4 + $0x140] sm:$0xff] }
 0x752   :  { %3953 = vmatpush3.bf16.xpose.msk.msra.mxu0 %vm4420_vm5, %v3948_v30  ;;  %v3970_v30 = vpack.c.bf16 %v1765_v28, %v1764_v5 }
 0x759   :  { %3666 = vmatmul.mubr.msk.f32.vlgmr.msra.gmra.mrb[10].mxu0 %vm137_vm3, %v1517_v36  ;;  %v3978_v36 = vpack.c.bf16 %v1769_v35, %v1768_v34 }
 0x823   :  { %v3660_v37 = vpop.f32.mrb[8].mxu0 }
 0x824   :  { %v1505_v38 = vpop.f32.mrb[9].mxu0 }
 0x82c   :  { %v3667_v39 = vpop.f32.mrb[10].mxu0 }
 0x82d   :  { %v1606_v40 = vmul.f32 0.17677669, %v3667_v39  ;;  %v1596_v41 = vpop.f32.mrb[11].mxu0 }
 0x82e   :  { %v1605_v42 = vmul.f32 0.17677669, %v1596_v41  ;;  %v1773_v41 = vld [vmem:[%s4856_s4 + $0x160] sm:$0xff] }
 0x82f   :  { %v1608_v46 = vadd.f32 %v1606_v40, %v4465_v29  ;;  %v1772_v40 = vld [vmem:[%s4856_s4 + $0x158] sm:$0xff] }
 0x830   :  { %v1607_v47 = vadd.f32 %v1605_v42, %v4467_v32  ;;  %v3986_v42 = vpack.c.bf16 %v1773_v41, %v1772_v40 }
 0x831   :  { %v1612_v48 = vsel %vm313_vm4, %v1608_v46, -inf }
 0x832   :  { %1613 = vmax.xlane.f32.xlu0 %v1612_v48  ;;  %v1609_v49 = vsel %vm313_vm4, %v1607_v47, -inf }
 0x833   :  { %1610 = vmax.xlane.f32.xlu1 %v1609_v49 }
 0x8bf   :  { %v1614_v7 = vpop.xlane.xlu0 %1613 }
 0x8c0   :  { %v1616_v55 = vsub.f32 %v1608_v46, %v1614_v7  ;;  %v1611_v56 = vpop.xlane.xlu1 %1610 }
 0x8c1   :  { %v1615_v57 = vsub.f32 %v1607_v47, %v1611_v56 }
 0x8c2   :  { %v1619_v58 = vmul.f32 1.442695, %v1616_v55  ;;  %v3288_v55 = vld [vmem:[%s4858_s5 + $0x5] ss:$0 sm:$0xff] }
 0x8c3   :  { %v1617_v59 = vmul.f32 1.442695, %v1615_v57 }
 0x8c4   :  { %4193 = vpow2.f32 %v1619_v58  ;;  %v4096_v58 = vadd.f32 %v4441_v12, %v3288_v55  ;;  %v1901_v12 = vld [vmem:[%s4856_s4 + $0x170] sm:$0xff] }
 0x8c5   :  { %4195 = vpow2.f32 %v1617_v59 }
 0x8ce   :  { %v4194_v60 = vpop.eup %4193 }
 0x8cf   :  { %v4196_v61 = vpop.eup %4195  ;;  %v1622_v62 = vmul.f32 %v4194_v60, %v4456_v25 }
 0x8d0   :  { %v1621_v63 = vmul.f32 %v4196_v61, %v4461_v26 }
 0x8d1   :  { %v1626_v0 = vsel %vm313_vm4, %v1622_v62, 0.0 }
 0x8d2   :  { %1627 = vadd.xlane.f32.xlu1 %v1626_v0  ;;  %v1623_v2 = vsel %vm313_vm4, %v1621_v63, 0.0 }
 0x8d3   :  { %1624 = vadd.xlane.f32.xlu0 %v1623_v2 }
 0x8e3   :  { %1726 = vrot.lane.b32.xlu1 %v4509_v54, %s4220_s27 }
 0x8e7   :  { %1728 = vrot.lane.b32.xlu1 %v4507_v53, %s4220_s27 }
 0x8e9   :  { %4165 = vrot.lane.b32.xlu0 %v4445_v18, %s4220_s27 }
 0x8eb   :  { %1736 = vrot.lane.b32.xlu1 %v3660_v37, %s4219_s2  ;;  %v1770_v37 = vld [vmem:[%s4856_s4 + $0x148] sm:$0xff] }
 0x8ed   :  { %1734 = vrot.lane.b32.xlu0 %v1505_v38, %s4219_s2  ;;  %v1771_v38 = vld [vmem:[%s4856_s4 + $0x150] sm:$0xff] }
 0x8ee   :  { %v3982_v39 = vpack.c.bf16 %v1771_v38, %v1770_v37 }
 0x95f   :  { %v1628_v3 = vpop.xlane.xlu1 %1627 }
 0x960   :  { %vm1630_vm14 = vcmp.gt.f32.partialorder %v1628_v3, 0.0  ;;  %v1625_v4 = vpop.xlane.xlu0 %1624 }
 0x961   :  { %v1632_v6 = vsel %vm1630_vm14, %v1628_v3, 1.0  ;;  %vm1629_vm15 = vcmp.gt.f32.partialorder %v1625_v4, 0.0 }
 0x962   :  { %4197 = vrcp.f32 %v1632_v6  ;;  %v1631_v9 = vsel %vm1629_vm15, %v1625_v4, 1.0 }
 0x963   :  { %4199 = vrcp.f32 %v1631_v9  ;;  %v1727_v48 = vpop.permute.xlu1 %1726  ;;  %v2399_v9 = vld [vmem:[%s4856_s4 + $0x210] sm:$0xff] }
 0x964   :  { %v4166_v10 = vpop.permute.xlu0 %4165  ;;  %v1748_v59 = vsel %vm137_vm3, %v4505_v51, %v1727_v48 }
 0x965   :  { %v4168_v54 = vunpack.i.h.bf16 %v4166_v10  ;;  %v4167_v11 = vunpack.i.l.bf16 %v4166_v10 }
 0x967   :  { %v3954_v13 = vpack.c.bf16 %v4168_v54, %v4167_v11  ;;  %v1729_v49 = vpop.permute.xlu1 %1728  ;;  %v1902_v54 = vld [vmem:[%s4856_s4 + $0x178] sm:$0xff]  ;;  %v1903_v11 = vld [vmem:[%s4856_s4 + $0x180] sm:$0xff] }
 0x968   :  { %v1735_v56 = vpop.permute.xlu0 %1734  ;;  %v1749_v57 = vsel %vm137_vm3, %v4503_v50, %v1729_v49  ;;  %v1900_v50 = vld [vmem:[%s4856_s4 + $0x168] sm:$0xff] }
 0x969   :  { %3955 = vmatprep.subr.bf16.mxu1 %v3954_v13  ;;  %v3990_v51 = vpack.c.bf16 %v1901_v12, %v1900_v50  ;;  %v2486_v50 = vld [vmem:[%s4856_s4 + $0x240] sm:$0xff] }
 0x96a   :  { %3957 = vmatpush3.bf16.msra.mxu1 %v3954_v13  ;;  %v2400_v13 = vld [vmem:[%s4856_s4 + $0x218] sm:$0xff] }
 0x96b   :  { %3959 = vmatprep.subr.bf16.mxu1 %v3958_v21  ;;  %v1737_v7 = vpop.permute.xlu1 %1736  ;;  %3991 = vmatprep.subr.bf16.mxu0 %v3990_v51 }
 0x96c   :  { %v4198_v53 = vpop.eup %4197  ;;  %v1752_v60 = vsel %vm1750_vm0, %v1749_v57, %v1737_v7  ;;  %3993 = vmatpush3.bf16.msra.mxu0 %v3990_v51 }
 0x96d   :  { %v4200_v18 = vpop.eup %4199  ;;  %v1636_v16 = vmul.f32 %v4198_v53, %v1622_v62  ;;  %v4097_v62 = vadd.f32 %v3288_v55, %v4443_v15  ;;  %v2398_v15 = vld [vmem:[%s4856_s4 + $0x208] sm:$0xff]  ;;  %v3994_v53 = vpack.c.bf16 %v1903_v11, %v1902_v54 }
 0x96e   :  { %v1634_v14 = vmul.f32 %v4200_v18, %v1621_v63  ;;  %v1751_v63 = vsel %vm1750_vm0, %v1748_v59, %v1735_v56  ;;  %v4030_v10 = vpack.c.bf16 %v2399_v9, %v2398_v15  ;;  %v2401_v18 = vld [vmem:[%s4856_s4 + $0x220] sm:$0xff]  ;;  %v2072_v11 = vld [vmem:[%s4856_s4 + $0x1a8] sm:$0xff] }
 0x96f   :  { %3995 = vmatprep.subr.bf16.mxu0 %v3994_v53 }
 0x970   :  { %3672 = vmatprep.mubr.msk.f32.mxu1 %vm313_vm4, %v1634_v14  ;;  %v4034_v14 = vpack.c.bf16 %v2401_v18, %v2400_v13  ;;  %3997 = vmatpush3.bf16.msra.mxu0 %v3994_v53  ;;  %v2073_v13 = vld [vmem:[%s4856_s4 + $0x1b0] sm:$0xff]  ;;  %v2564_v53 = vld [vmem:[%s4856_s4 + $0x248] sm:$0xff] }
 0x971   :  { %3673 = vmatmul.mubr.msk.f32.vlgmr.msra.gmra.mrb[14].mxu1 %vm313_vm4, %v1636_v16  ;;  %v1991_v16 = vld [vmem:[%s4856_s4 + $0x188] sm:$0xff]  ;;  %v2565_v18 = vld [vmem:[%s4856_s4 + $0x250] sm:$0xff] }
 0x972   :  { %3961 = vmatpush3.bf16.msra.mxu1 %v3958_v21  ;;  %v3998_v20 = vpack.c.bf16 %v1992_v17, %v1991_v16  ;;  %v2484_v21 = vld [vmem:[%s4856_s4 + $0x230] sm:$0xff]  ;;  %v4046_v16 = vpack.c.bf16 %v2565_v18, %v2564_v53  ;;  %v2152_v17 = vld [vmem:[%s4856_s4 + $0x1b8] sm:$0xff] }
 0x973   :  { %3963 = vmatprep.subr.bf16.mxu1 %v3962_v23  ;;  %v4038_v22 = vpack.c.bf16 %v2484_v21, %v2483_v19  ;;  %v2153_v19 = vld [vmem:[%s4856_s4 + $0x1c0] sm:$0xff]  ;;  %v2154_v21 = vld [vmem:[%s4856_s4 + $0x1c8] sm:$0xff] }
 0x974   :  { %3999 = vmatprep.subr.bf16.mxu0 %v3998_v20 }
 0x976   :  { %3965 = vmatpush3.bf16.msra.mxu1 %v3962_v23  ;;  %v3315_v23 = vld [vmem:[%s4858_s5 + $0x6] ss:$0 sm:$0xff] }
 0x977   :  { %3967 = vmatprep.subr.bf16.mxu1 %v3966_v27 }
 0x97a   :  { %3969 = vmatpush3.bf16.msra.mxu1 %v3966_v27 }
 0x97b   :  { %3971 = vmatprep.subr.bf16.mxu1 %v3970_v30 }
 0x97e   :  { %3973 = vmatpush3.bf16.msra.mxu1 %v3970_v30 }
 0x97f   :  { %3975 = vmatprep.subr.bf16.mxu1 %v3974_v33 }
 0x982   :  { %3977 = vmatpush3.bf16.msra.mxu1 %v3974_v33 }
 0x983   :  { %3979 = vmatprep.subr.bf16.mxu1 %v3978_v36 }
 0x986   :  { %3981 = vmatpush3.bf16.msra.mxu1 %v3978_v36 }
 0x987   :  { %3983 = vmatprep.subr.bf16.mxu1 %v3982_v39 }
 0x98a   :  { %3985 = vmatpush3.bf16.msra.mxu1 %v3982_v39 }
 0x98b   :  { %3987 = vmatprep.subr.bf16.mxu1 %v3986_v42 }
 0x98e   :  { %3989 = vmatpush3.bf16.msra.mxu1 %v3986_v42 }
 0x98f   :  { %4031 = vmatprep.subr.bf16.mxu1 %v4030_v10 }
 0xa44   :  { %v3674_v46 = vpop.f32.mrb[14].mxu1 }
 0xa45   :  { %1744 = vrot.lane.b32.xlu1 %v3674_v46, %s4217_s20  ;;  %v1715_v47 = vpop.f32.mrb[15].mxu1 }
 0xa46   :  { %1742 = vrot.lane.b32.xlu0 %v1715_v47, %s4217_s20 }
 0xab7   :  { %v1745_v61 = vpop.permute.xlu1 %1744 }
 0xab8   :  { %v1755_v0 = vsel %vm1753_vm1, %v1752_v60, %v1745_v61  ;;  %v1743_v2 = vpop.permute.xlu0 %1742  ;;  %v3317_v61 = vld [vmem:[%s4858_s5 + $0x8] ss:$0 sm:$0xff] }
 0xab9   :  { %v1757_v3 = vadd.f32 %v4096_v58, %v1755_v0  ;;  %v1754_v4 = vsel %vm1753_vm1, %v1751_v63, %v1743_v2  ;;  %v3316_v58 = vld [vmem:[%s4858_s5 + $0x7] ss:$0 sm:$0xff] }
 0xaba   :  { %v1756_v6 = vadd.f32 %v4097_v62, %v1754_v4  ;;  %v1994_v4 = vld [vmem:[%s4856_s4 + $0x1a0] sm:$0xff] }
 0xabc   :  { %3707 = vmatprep.mubr.f32.mxu1 %v1756_v6  ;;  %v2485_v6 = vld [vmem:[%s4856_s4 + $0x238] sm:$0xff] }
 0xabd   :  { %3708 = vmatmul.mubr.f32.vlgmr.msra.gmra.mrb[16].mxu1 %v1757_v3  ;;  %v1993_v3 = vld [vmem:[%s4856_s4 + $0x198] sm:$0xff]  ;;  %v4042_v54 = vpack.c.bf16 %v2486_v50, %v2485_v6 }
 0xabe   :  { %4033 = vmatpush3.bf16.msra.mxu1 %v4030_v10  ;;  %v4002_v10 = vpack.c.bf16 %v1994_v4, %v1993_v3 }
 0xabf   :  { %4035 = vmatprep.subr.bf16.mxu1 %v4034_v14 }
 0xac2   :  { %4037 = vmatpush3.bf16.msra.mxu1 %v4034_v14  ;;  %v4006_v14 = vpack.c.bf16 %v2073_v13, %v2072_v11 }
 0xac3   :  { %4039 = vmatprep.subr.bf16.mxu1 %v4038_v22 }
 0xb90   :  { %v3709_v8 = vpop.f32.mrb[16].mxu1 }
 0xb91   :  { %v1851_v24 = vadd.f32 %v3709_v8, %v3315_v23  ;;  %v1845_v27 = vpop.f32.mrb[17].mxu1  ;;  %v2237_v8 = vld [vmem:[%s4856_s4 + $0x1d8] sm:$0xff] }
 0xb92   :  { %v1846_v5 = vadd.f32 %v3315_v23, %v1845_v27  ;;  %v2239_v27 = vld [vmem:[%s4856_s4 + $0x1e8] sm:$0xff] }
 0xb94   :  { %v1854_v28 = vadd.f32 %v1851_v24, %v1846_v5 }
 0xb96   :  { %v1855_v30 = vrot.slane %v1854_v28, 4 }
 0xb98   :  { %v1856_v1 = vadd.f32 %v1855_v30, %v1854_v28  ;;  %v2318_v30 = vld [vmem:[%s4856_s4 + $0x1f8] sm:$0xff] }
 0xb9a   :  { %v1857_v31 = vrot.slane %v1856_v1, 2 }
 0xb9c   :  { %v1858_v33 = vadd.f32 %v1857_v31, %v1856_v1  ;;  %v2319_v1 = vld [vmem:[%s4856_s4 + $0x200] sm:$0xff] }
 0xb9d   :  { %v4026_v31 = vpack.c.bf16 %v2319_v1, %v2318_v30 }
 0xb9e   :  { %v1859_v34 = vrot.slane %v1858_v33, 1 }
 0xba0   :  { %v1860_v35 = vadd.f32 %v1859_v34, %v1858_v33  ;;  %v2644_v33 = vld [vmem:[%s4856_s4 + $0x258] sm:$0xff]  ;;  %v2645_v34 = vld [vmem:[%s4856_s4 + $0x260] sm:$0xff] }
 0xba2   :  { %v1862_v36 = vmul.f32 0.0625, %v1860_v35  ;;  %v4050_v35 = vpack.c.bf16 %v2645_v34, %v2644_v33  ;;  %v3084_v34 = vld [vmem:[%s4856_s4 + $0x2b8] sm:$0xff] }
 0xba4   :  { %v1863_v37 = vsub.f32 %v1846_v5, %v1862_v36  ;;  %v1864_v38 = vsub.f32 %v1851_v24, %v1862_v36  ;;  %v2238_v24 = vld [vmem:[%s4856_s4 + $0x1e0] sm:$0xff]  ;;  %v2240_v5 = vld [vmem:[%s4856_s4 + $0x1f0] sm:$0xff] }
 0xba5   :  { %v4022_v28 = vpack.c.bf16 %v2240_v5, %v2239_v27  ;;  %v4215_v36 = vld [vmem:[%s4859_s3] sm:$0xff] }
 0xba6   :  { %v1865_v39 = vmul.f32 %v1863_v37, %v1863_v37  ;;  %v1866_v40 = vmul.f32 %v1864_v38, %v1864_v38 }
 0xba8   :  { %v1867_v41 = vadd.f32 %v1866_v40, %v1865_v39  ;;  %v2729_v40 = vld [vmem:[%s4856_s4 + $0x278] sm:$0xff] }
 0xbaa   :  { %v1868_v42 = vrot.slane %v1867_v41, 4 }
 0xbac   :  { %v1869_v46 = vadd.f32 %v1868_v42, %v1867_v41  ;;  %v2730_v41 = vld [vmem:[%s4856_s4 + $0x280] sm:$0xff] }
 0xbad   :  { %v4058_v42 = vpack.c.bf16 %v2730_v41, %v2729_v40  ;;  %v3164_v40 = vld [vmem:[%s4856_s4 + $0x2d0] sm:$0xff] }
 0xbae   :  { %v1870_v47 = vrot.slane %v1869_v46, 2 }
 0xbb0   :  { %v1871_v48 = vadd.f32 %v1870_v47, %v1869_v46  ;;  %v2731_v46 = vld [vmem:[%s4856_s4 + $0x288] sm:$0xff]  ;;  %v2732_v47 = vld [vmem:[%s4856_s4 + $0x290] sm:$0xff] }
 0xbb2   :  { %v1872_v49 = vrot.slane %v1871_v48, 1 }
 0xbb4   :  { %v1873_v7 = vadd.f32 %v1872_v49, %v1871_v48  ;;  %v4062_v48 = vpack.c.bf16 %v2732_v47, %v2731_v46  ;;  %v2811_v49 = vld [vmem:[%s4856_s4 + $0x2a0] sm:$0xff] }
 0xbb6   :  { %v1874_v55 = vmul.f32 0.0625, %v1873_v7 }
 0xbb8   :  { %v1875_v56 = vadd.f32 1e-05, %v1874_v55  ;;  %v3334_v55 = vld [vmem:[%s4858_s5 + $0xb] ss:$0 sm:$0xff] }
 0xbba   :  { %4201 = vrsqrt.f32 %v1875_v56 }
 0xbc4   :  { %v4202_v57 = vpop.eup %4201 }
 0xbc5   :  { %v1877_v59 = vmul.f32 %v4202_v57, %v1863_v37  ;;  %v1878_v60 = vmul.f32 %v4202_v57, %v1864_v38  ;;  %v2646_v37 = vld [vmem:[%s4856_s4 + $0x268] sm:$0xff]  ;;  %v2647_v38 = vld [vmem:[%s4856_s4 + $0x270] sm:$0xff] }
 0xbc6   :  { %v4054_v39 = vpack.c.bf16 %v2647_v38, %v2646_v37  ;;  %v4223_v37 = vmov 0.0  }
 0xbc7   :  { %v1884_v62 = vmul.f32 %v3316_v58, %v1877_v59  ;;  %v1885_v63 = vmul.f32 %v3316_v58, %v1878_v60 }
 0xbc9   :  { %v1891_v0 = vadd.f32 %v3317_v61, %v1884_v62  ;;  %v1892_v2 = vadd.f32 %v3317_v61, %v1885_v63 }
 0xbcb   :  { %vm1893_vm2 = vcmp.ge.f32.partialorder %v1891_v0, 0.0  ;;  %v1895_v12 = vmul.f32 0.01, %v1891_v0  ;;  %vm1894_vm5 = vcmp.ge.f32.partialorder %v1892_v2, 0.0  ;;  %v1896_v51 = vmul.f32 0.01, %v1892_v2 }
 0xbcd   :  { %v4669_v15 = vsel %vm1893_vm2, %v1891_v0, %v1895_v12  ;;  %v4671_v9 = vsel %vm1894_vm5, %v1892_v2, %v1896_v51  ;;  %v3327_v0 = vld [vmem:[%s4858_s5 + $0xa] ss:$0 sm:$0xff] }
 0xbce   :  { %3718 = vmatprep.mubr.msk.f32.mxu0 %vm137_vm3, %v4669_v15  ;;  %3776 = vmatprep.mubr.msk.f32.mxu1 %vm137_vm3, %v4669_v15 }
 0xbcf   :  { %3719 = vmatmul.mubr.msk.f32.vlgmr.msra.gmra.mrb[12].mxu0 %vm137_vm3, %v4671_v9  ;;  %3777 = vmatmul.mubr.msk.f32.vlgmr.msra.gmra.mrb[18].mxu1 %vm137_vm3, %v4671_v9 }
 0xbd0   :  { %4001 = vmatpush3.bf16.msra.mxu0 %v3998_v20  ;;  %3729 = vmatprep.mubr.msk.f32.mxu0 %vm137_vm3, %v4336_v43  ;;  %v4010_v20 = vpack.c.bf16 %v2153_v19, %v2152_v17 }
 0xbd1   :  { %4041 = vmatpush3.bf16.msra.mxu1 %v4038_v22  ;;  %3787 = vmatprep.mubr.msk.f32.mxu1 %vm137_vm3, %v4336_v43  ;;  %v2155_v22 = vld [vmem:[%s4856_s4 + $0x1d0] sm:$0xff] }
 0xbd2   :  { %4003 = vmatprep.subr.bf16.mxu0 %v4002_v10  ;;  %4043 = vmatprep.subr.bf16.mxu1 %v4042_v54  ;;  %v4014_v23 = vpack.c.bf16 %v2155_v22, %v2154_v21 }
 0xbd4   :  { %4005 = vmatpush3.bf16.msra.mxu0 %v4002_v10 }
 0xbd5   :  { %4045 = vmatpush3.bf16.msra.mxu1 %v4042_v54  ;;  %4007 = vmatprep.subr.bf16.mxu0 %v4006_v14 }
 0xbd6   :  { %4047 = vmatprep.subr.bf16.mxu1 %v4046_v16 }
 0xbd7   :  { %3730 = vmatmul.mubr.msk.f32.vlgmr.msra.gmra.mrb[12].mxu0 %vm137_vm3, %v4338_v44 }
 0xbd8   :  { %3788 = vmatmul.mubr.msk.f32.vlgmr.msra.gmra.mrb[18].mxu1 %vm137_vm3, %v4338_v44  ;;  %4009 = vmatpush3.bf16.msra.mxu0 %v4006_v14 }
 0xbd9   :  { %4049 = vmatpush3.bf16.msra.mxu1 %v4046_v16  ;;  %3736 = vmatprep.mubr.msk.f32.mxu0 %vm313_vm4, %v4347_v45 }
 0xbda   :  { %4011 = vmatprep.subr.bf16.mxu0 %v4010_v20  ;;  %3794 = vmatprep.mubr.msk.f32.mxu1 %vm313_vm4, %v4347_v45  ;;  %v4018_v45 = vpack.c.bf16 %v2238_v24, %v2237_v8 }
 0xbdf   :  { %3737 = vmatmul.mubr.msk.f32.vlgmr.msra.gmra.mrb[12].mxu0 %vm313_vm4, %v4372_v52 }
 0xbe0   :  { %4013 = vmatpush3.bf16.msra.mxu0 %v4010_v20  ;;  %3795 = vmatmul.mubr.msk.f32.vlgmr.msra.gmra.mrb[18].mxu1 %vm313_vm4, %v4372_v52 }
 0xbe1   :  { %3747 = vmatprep.mubr.msk.f32.mxu0 %vm137_vm3, %v4669_v15  ;;  %4015 = vmatprep.subr.bf16.mxu0 %v4014_v23 }
 0xbe4   :  { %4017 = vmatpush3.bf16.msra.mxu0 %v4014_v23 }
 0xbe5   :  { %4019 = vmatprep.subr.bf16.mxu0 %v4018_v45 }
 0xbe7   :  { %3748 = vmatmul.mubr.msk.f32.vlgmr.msra.gmra.mrb[14].mxu0 %vm137_vm3, %v4671_v9 }
 0xbe8   :  { %4021 = vmatpush3.bf16.msra.mxu0 %v4018_v45  ;;  %3758 = vmatprep.mubr.msk.f32.mxu0 %vm137_vm3, %v4336_v43 }
 0xbe9   :  { %4023 = vmatprep.subr.bf16.mxu0 %v4022_v28 }
 0xbec   :  { %4025 = vmatpush3.bf16.msra.mxu0 %v4022_v28 }
 0xbed   :  { %4027 = vmatprep.subr.bf16.mxu0 %v4026_v31 }
 0xbef   :  { %3759 = vmatmul.mubr.msk.f32.vlgmr.msra.gmra.mrb[14].mxu0 %vm137_vm3, %v4338_v44 }
 0xbf0   :  { %4029 = vmatpush3.bf16.msra.mxu0 %v4026_v31  ;;  %3765 = vmatprep.mubr.msk.f32.mxu0 %vm313_vm4, %v4215_v36  ;;  %v3083_v31 = vld [vmem:[%s4856_s4 + $0x2b0] sm:$0xff] }
 0xbf1   :  { %4051 = vmatprep.subr.bf16.mxu0 %v4050_v35 }
 0xbf7   :  { %3766 = vmatmul.mubr.msk.f32.vlgmr.msra.gmra.mrb[14].mxu0 %vm313_vm4, %v4372_v52  ;;  %v2810_v52 = vld [vmem:[%s4856_s4 + $0x298] sm:$0xff] }
 0xbf8   :  { %4053 = vmatpush3.bf16.msra.mxu0 %v4050_v35  ;;  %3805 = vmatprep.mubr.msk.f32.mxu0 %vm137_vm3, %v4669_v15  ;;  %v4066_v7 = vpack.c.bf16 %v2811_v49, %v2810_v52  ;;  %v3085_v35 = vld [vmem:[%s4856_s4 + $0x2c0] sm:$0xff] }
 0xbf9   :  { %4055 = vmatprep.subr.bf16.mxu0 %v4054_v39  ;;  %v4082_v38 = vpack.c.bf16 %v3085_v35, %v3084_v34 }
 0xbfc   :  { %4057 = vmatpush3.bf16.msra.mxu0 %v4054_v39  ;;  %v3163_v39 = vld [vmem:[%s4856_s4 + $0x2c8] sm:$0xff] }
 0xbfd   :  { %4059 = vmatprep.subr.bf16.mxu0 %v4058_v42  ;;  %v4085_v41 = vpack.c.bf16 %v3164_v40, %v3163_v39 }
 0xbff   :  { %3806 = vmatmul.mubr.msk.f32.vlgmr.msra.gmra.mrb[16].mxu0 %vm137_vm3, %v4671_v9 }
 0xc00   :  { %4061 = vmatpush3.bf16.msra.mxu0 %v4058_v42  ;;  %3816 = vmatprep.mubr.msk.f32.mxu0 %vm137_vm3, %v4336_v43  ;;  %v4216_v43 = vld [vmem:[%s4859_s3 + $0x8] sm:$0xff] }
 0xc01   :  { %4063 = vmatprep.subr.bf16.mxu0 %v4062_v48  ;;  %v3341_v42 = vld [vmem:[%s4858_s5 + $0xc] ss:$0 sm:$0xff] }
 0xc04   :  { %4065 = vmatpush3.bf16.msra.mxu0 %v4062_v48 }
 0xc05   :  { %4067 = vmatprep.subr.bf16.mxu0 %v4066_v7 }
 0xc07   :  { %3817 = vmatmul.mubr.msk.f32.vlgmr.msra.gmra.mrb[16].mxu0 %vm137_vm3, %v4338_v44  ;;  %v3320_v44 = vld [vmem:[%s4858_s5 + $0x9] ss:$0 sm:$0xff] }
 0xc08   :  { %3823 = vmatprep.mubr.msk.f32.mxu0 %vm313_vm4, %v4215_v36  ;;  %4069 = vmatpush3.bf16.msra.mxu0 %v4066_v7  ;;  %v4221_v36 = vmov 0.0|0.0   ;;  %v3165_v7 = vld [vmem:[%s4856_s4 + $0x2d8] sm:$0xff] }
 0xc0f   :  { %3824 = vmatmul.mubr.msk.f32.vlgmr.msra.gmra.mrb[16].mxu0 %vm313_vm4, %v4216_v43  ;;  %v3166_v43 = vld [vmem:[%s4856_s4 + $0x2e0] sm:$0xff] }
 0xcb2   :  { %v3738_v56 = vpop.f32.mrb[12].mxu0 }
 0xcb3   :  { %v3796_v57 = vpop.f32.mrb[18].mxu1  ;;  %v2140_v58 = vpop.f32.mrb[13].mxu0  ;;  %v4098_v12 = vadd.f32 %v3738_v56, %v3320_v44 }
 0xcb4   :  { %v4102_v59 = vadd.f32 %v3796_v57, %v3334_v55  ;;  %v4099_v60 = vadd.f32 %v3320_v44, %v2140_v58  ;;  %v2632_v61 = vpop.f32.mrb[19].mxu1  ;;  %v4088_v44 = vpack.c.bf16 %v3166_v43, %v3165_v7 }
 0xcb5   :  { %v4103_v62 = vadd.f32 %v3334_v55, %v2632_v61  ;;  %v3086_v55 = vld [vmem:[%s4858_s5 + $0xd] sm:$0x1]  ;;  %v3167_v61 = vld [vmem:[%s4858_s5 + $0xe] sm:$0x1] }
 0xcb6   :  { %3830 = vmatprep.mubr.f32.mxu1 %v4099_v60 }
 0xcb7   :  { %v4074_v63 = vpack.c.bf16 %v4102_v59, %v4103_v62 }
 0xcb9   :  { %4075 = vmatprep.subr.bf16.mxu0 %v4074_v63 }
 0xcba   :  { %4077 = vmatpush3.bf16.msra.mxu0 %v4074_v63 }
 0xcbb   :  { %4084 = vmatprep.subr.bf16.mxu0 %v4221_v36 }
 0xcca   :  { %v3767_v2 = vpop.f32.mrb[14].mxu0 }
 0xccb   :  { %v4100_v3 = vadd.f32 %v3767_v2, %v3327_v0  ;;  %v2386_v4 = vpop.f32.mrb[15].mxu0 }
 0xccc   :  { %v4101_v6 = vadd.f32 %v3327_v0, %v2386_v4 }
 0xcce   :  { %v4070_v50 = vpack.c.bf16 %v4100_v3, %v4101_v6 }
 0xcd0   :  { %4071 = vmatprep.subr.bf16.mxu1 %v4070_v50 }
 0xcd1   :  { %4073 = vmatpush3.bf16.xpose.msra.mxu1 %v4070_v50 }
 0xcd2   :  { %4078 = vmatprep.subr.bf16.mxu1 %v4221_v36 }
 0xcd8   :  { %3831 = vmatmul.mubr.f32.vlgmr.msra.gmra.mrb[20].mxu1 %v4098_v12 }
 0xdab   :  { %v3832_v51 = vpop.f32.mrb[20].mxu1 }
 0xdac   :  { %v2965_v15 = vmul.f32 0.17677669, %v3832_v51  ;;  %v2955_v9 = vpop.f32.mrb[21].mxu1 }
 0xdad   :  { %v2964_v10 = vmul.f32 0.17677669, %v2955_v9 }
 0xdae   :  { %v2967_v54 = vadd.f32 %v2965_v15, %v4465_v29  ;;  %v3255_v15 = vlaneseq }
 0xdaf   :  { %v2966_v11 = vadd.f32 %v2964_v10, %v4467_v32 }
 0xdb0   :  { %v2971_v13 = vsel %vm313_vm4, %v2967_v54, -inf  ;;  %v3256_v9 = vshrl.u32 %v3255_v15, 7 }
 0xdb1   :  { %2972 = vmax.xlane.f32.xlu1 %v2971_v13  ;;  %v2968_v53 = vsel %vm313_vm4, %v2966_v11, -inf }
 0xdb2   :  { %2969 = vmax.xlane.f32.xlu0 %v2968_v53 }
 0xe3e   :  { %v2973_v18 = vpop.xlane.xlu1 %2972 }
 0xe3f   :  { %v2975_v14 = vsub.f32 %v2967_v54, %v2973_v18  ;;  %v2970_v16 = vpop.xlane.xlu0 %2969 }
 0xe40   :  { %v2974_v17 = vsub.f32 %v2966_v11, %v2970_v16  ;;  %v3257_v11 = vsub.s32 0, %v3256_v9 }
 0xe41   :  { %v2978_v19 = vmul.f32 1.442695, %v2975_v14 }
 0xe42   :  { %v2976_v20 = vmul.f32 1.442695, %v2974_v17 }
 0xe43   :  { %4203 = vpow2.f32 %v2978_v19 }
 0xe44   :  { %4205 = vpow2.f32 %v2976_v20 }
 0xe4d   :  { %v4204_v21 = vpop.eup %4203 }
 0xe4e   :  { %v4206_v22 = vpop.eup %4205  ;;  %v2981_v23 = vmul.f32 %v4204_v21, %v4456_v25  ;;  %v3082_v25 = vld [vmem:[%s4856_s4 + $0x2a8] sm:$0xff] }
 0xe4f   :  { %v2980_v29 = vmul.f32 %v4206_v22, %v4461_v26  ;;  %v4079_v33 = vpack.c.bf16 %v3083_v31, %v3082_v25 }
 0xe50   :  { %v2985_v8 = vsel %vm313_vm4, %v2981_v23, 0.0 }
 0xe51   :  { %v2982_v32 = vsel %vm313_vm4, %v2980_v29, 0.0  ;;  %4080 = vmatpush3.bf16.msra.mxu1 %v4079_v33 }
 0xe52   :  { %2983 = vadd.xlane.f32.xlu0 %v2982_v32  ;;  %4081 = vmatprep.subr.bf16.mxu1 %v4221_v36 }
 0xe55   :  { %4083 = vmatpush3.bf16.msra.mxu1 %v4082_v38 }
 0xe56   :  { %2986 = vadd.xlane.f32.xlu0 %v2985_v8 }
 0xedf   :  { %v2984_v24 = vpop.xlane.xlu0 %2983 }
 0xee0   :  { %vm2988_vm6 = vcmp.gt.f32.partialorder %v2984_v24, 0.0 }
 0xee1   :  { %v2990_v45 = vsel %vm2988_vm6, %v2984_v24, 1.0 }
 0xee2   :  { %4207 = vrcp.f32 %v2990_v45 }
 0xee3   :  { %v2987_v27 = vpop.xlane.xlu0 %2986 }
 0xee4   :  { %vm2989_vm7 = vcmp.gt.f32.partialorder %v2987_v27, 0.0 }
 0xee5   :  { %v2991_v5 = vsel %vm2989_vm7, %v2987_v27, 1.0 }
 0xee6   :  { %4209 = vrcp.f32 %v2991_v5 }
 0xeec   :  { %v4208_v28 = vpop.eup %4207 }
 0xeed   :  { %v2993_v30 = vmul.f32 %v4208_v28, %v2980_v29 }
 0xeef   :  { %3837 = vmatprep.mubr.msk.f32.mxu0 %vm313_vm4, %v2993_v30 }
 0xef0   :  { %v4210_v26 = vpop.eup %4209 }
 0xef1   :  { %v2995_v1 = vmul.f32 %v4210_v26, %v2981_v23 }
 0xef3   :  { %3838 = vmatmul.mubr.msk.f32.vlgmr.msra.gmra.mrb[16].mxu0 %vm313_vm4, %v2995_v1  ;;  %vm4222_vm4 = vmmov 0  }
 0xef4   :  { %3848 = vmatprep.mubr.msk.f32.mxu1 %vm4222_vm4, %v4223_v37  ;;  %3859 = vmatprep.mubr.msk.f32.mxu0 %vm4222_vm4, %v4223_v37 }
 0xef5   :  { %4086 = vmatpush3.bf16.msra.mxu0 %v4085_v41 }
 0xef6   :  { %4087 = vmatprep.subr.bf16.mxu0 %v4221_v36 }
 0xef9   :  { %4089 = vmatpush3.bf16.msra.mxu0 %v4088_v44 }
 0xfc6   :  { %v3839_v46 = vpop.f32.mrb[16].mxu0 }
 0xfc7   :  { %v4104_v47 = vadd.f32 %v3839_v46, %v3341_v42  ;;  %v3068_v48 = vpop.f32.mrb[17].mxu0 }
 0xfc8   :  { %v4105_v52 = vadd.f32 %v3341_v42, %v3068_v48 }
 0xfc9   :  { %3078 = vst [vmem:[#allocation2 + $0x8] sm:$0xff] %v4104_v47 }
 0xfca   :  { %3077 = vst [vmem:[#allocation2] sm:$0xff] %v4105_v52 }
 0xfd1   :  { %v3081_v49 = vld [vmem:[%s3080_s18] sm:$0x1] }
 0xfd2   :  { %3849 = vmatmul.mubr.msk.f32.vlgmr.msra.gmra.mrb[22].mxu1 %vm137_vm3, %v3081_v49 }
0x10a5   :  { %v3156_v56 = vpop.f32.mrb[22].mxu1 }
0x10a6   :  { %v3157_v57 = vadd.f32 %v3156_v56, %v3086_v55  ;;  %v3850_v58 = vpop.f32.mrb[23].mxu1 }
0x10a8   :  { %vm3160_vm8 = vcmp.ge.f32.partialorder %v3157_v57, 0.0  ;;  %v3161_v59 = vmul.f32 0.01, %v3157_v57 }
0x10aa   :  { %v3162_v60 = vsel %vm3160_vm8, %v3157_v57, %v3161_v59 }
0x10ab   :  { %3860 = vmatmul.mubr.msk.f32.vlgmr.msra.gmra.mrb[18].mxu0 %vm137_vm3, %v3162_v60 }
0x117e   :  { %v3237_v62 = vpop.f32.mrb[18].mxu0 }
0x117f   :  { %v3238_v63 = vadd.f32 %v3237_v62, %v3167_v61  ;;  %v3861_v0 = vpop.f32.mrb[19].mxu0 }
0x1181   :  { %v3242_v2 = vsel %vm3241_vm9, %v3238_v63, -inf }
0x1182   :  { %3243 = vmax.xlane.f32.xlu1 %v3242_v2 }
0x120f   :  { %v3244_v3 = vpop.xlane.xlu1 %3243 }
0x1210   :  { %v3245_v4 = vsub.f32 %v3238_v63, %v3244_v3 }
0x1212   :  { %v3246_v6 = vmul.f32 1.442695, %v3245_v4 }
0x1214   :  { %4211 = vpow2.f32 %v3246_v6 }
0x121e   :  { %v4212_v50 = vpop.eup %4211 }
0x121f   :  { %v3248_v12 = vsel %vm3241_vm9, %v4212_v50, 0.0 }
0x1220   :  { %3249 = vadd.xlane.f32.xlu0 %v3248_v12 }
0x12ad   :  { %v3250_v51 = vpop.xlane.xlu0 %3249 }
0x12ae   :  { %4213 = vlog2.f32 %v3250_v51 }
0x12b8   :  { %v4214_v10 = vpop.eup %4213 }
0x12b9   :  { %v3252_v54 = vmul.f32 0.6931472, %v4214_v10 }
0x12bb   :  { %v3253_v13 = vadd.f32 %v3252_v54, %v3244_v3 }
0x12bd   :  { %v3254_v53 = vsub.f32 %v3238_v63, %v3253_v13 }
0x12bf   :  { %v3258_v18 = vrot.slane %v3254_v53, %v3257_v11 }
0x12c1   :  { %3259 = vst [vmem:[%s4862_s6] sm:$0xff] %v3258_v18 }

</bundles_post_ra>
